<compile_context>
chip_gen: v7x
topology: tpu7x:2x2x1
jax: 0.10.0
libtpu: 0.0.40
codegen_flags: <defaults>
</compile_context>

<pallas_src>
import math
import jax
import jax.numpy as jnp
from jax.experimental import pallas as pl
from jax.experimental.pallas import tpu as pltpu

FILTER_SIZES = (1, 2, 3)


def textcnn_kernel(ids_ref, table_hbm, wcat_ref, bconv_ref, wfc_ref, bfc_ref,
                   out_ref, emb_ref, sem):
    # ids_ref  : (B*L,)   int32  SMEM (scalar prefetch)  all token ids
    # table_hbm: (V, E)   f32    HBM (pl.ANY)            embedding table
    # wcat_ref : (E, 6F)  bf16   conv taps [f1t0 | f2t0 f2t1 | f3t0 f3t1 f3t2]
    # bconv_ref: (1, 3F)  f32    conv biases [b1 | b2 | b3]
    # wfc_ref  : (3F, C)  bf16   fc weight (in x out)
    # bfc_ref  : (1, C)   f32
    # out_ref  : (Bt, C)  f32
    # emb_ref  : (Bt*L, E) f32   VMEM scratch for gathered embedding rows
    # sem      : DMA semaphore
    BtL, E = emb_ref.shape
    Bt, C = out_ref.shape
    L = BtL // Bt
    F = wfc_ref.shape[0] // len(FILTER_SIZES)

    base = pl.program_id(0) * BtL

    # ---- embedding: per-row DMA gather from HBM (no one-hot matmul) --------
    def issue(r, carry):
        tok = ids_ref[base + r]
        pltpu.make_async_copy(table_hbm.at[tok], emb_ref.at[r], sem).start()
        return carry
    jax.lax.fori_loop(0, BtL, issue, 0)

    def drain(r, carry):
        # same-size descriptor as each issued copy; one wait retires one row.
        pltpu.make_async_copy(table_hbm.at[0], emb_ref.at[r], sem).wait()
        return carry
    jax.lax.fori_loop(0, BtL, drain, 0)

    emb = emb_ref[...].astype(jnp.bfloat16)                      # (BtL, E)

    # ---- all 6 conv taps in one lane-dense MXU matmul -----------------------
    y = jnp.dot(emb, wcat_ref[...],
                preferred_element_type=jnp.float32)              # (BtL, 6F) f32

    bconv = bconv_ref[...]                                       # (1, 3F)
    t_idx = jax.lax.broadcasted_iota(jnp.int32, (Bt, L, F), 1)   # time index

    pooled = []
    tap = 0
    for ki, k in enumerate(FILTER_SIZES):
        acc = y[:, tap * F:(tap + 1) * F]                        # j = 0 tap
        for j in range(1, k):
            yj = y[:, (tap + j) * F:(tap + j + 1) * F]
            # rolled[r] = yj[(r + j) mod BtL]; rows that wrap into the next
            # batch element only land on t >= L-k+1 (masked below).
            acc = acc + pltpu.roll(yj, shift=BtL - j, axis=0)
        tap += k
        acc = acc.reshape(Bt, L, F) \
            + bconv[:, ki * F:(ki + 1) * F].reshape(1, 1, F)     # + bias
        acc = jnp.maximum(acc, 0.0)                              # relu (f32, VPU)
        # mask AFTER relu (outputs >= 0) so -1.0 never wins the max;
        # if the activation ever changes, this value must become -inf.
        acc = jnp.where(t_idx < (L - k + 1), acc, -1.0)
        pooled.append(jnp.max(acc, axis=1))                      # (Bt, F)

    # ---- fc: single fused (Bt, 3F) @ (3F, C) matmul --------------------------
    feat = jnp.concatenate(pooled, axis=-1).astype(jnp.bfloat16)  # (Bt, 3F)
    out = jnp.dot(feat, wfc_ref[...], preferred_element_type=jnp.float32)
    out_ref[...] = (out + bfc_ref[...]).astype(out_ref.dtype)


def textcnn_forward(x_tokens, params, *, b_tile=None):
    """x_tokens: (B, L) int32 token ids."""
    B, L = x_tokens.shape
    table = params["embedding"]                                   # (V, E) f32, HBM
    V, E = table.shape
    F = params["convs"][0][0].shape[-1]
    C = params["wfc"].shape[1]
    nt = sum(FILTER_SIZES)                                        # 6 taps
    nf = len(FILTER_SIZES)                                        # 3 filters

    if b_tile is None:
        # v6e/v7x: want BtL = b_tile*L >= 256 to fill the 256x256 MXU;
        # v7x: want grid length >= 2 and even so both TensorCores get work;
        # with the gather, the per-tile working set is a few MB (fits v7x VMEM).
        b_tile = B
        for cand in (64, 32, 16, 8):
            if B % cand == 0 and (B // cand) >= 2 and (B // cand) % 2 == 0:
                b_tile = cand
                break
    assert B % b_tile == 0 and (b_tile % 8 == 0 or b_tile == B)
    assert L % 8 == 0, "pad the sequence so L is a multiple of 8"

    taps = [params["convs"][ki][0][j]
            for ki, k in enumerate(FILTER_SIZES) for j in range(k)]
    wcat = jnp.concatenate(taps, axis=-1).astype(jnp.bfloat16)    # (E, 6F)
    bconv = jnp.concatenate(
        [b for (_, b) in params["convs"]]).reshape(1, -1)         # (1, 3F) f32
    wfc = params["wfc"].astype(jnp.bfloat16)                      # (3F, C)
    bfc = params["bfc"].reshape(1, -1)                            # (1, C)  f32

    ids = x_tokens.reshape(B * L).astype(jnp.int32)               # SMEM prefetch

    # cost estimate reflects the gather (no V*E one-hot term)
    flops = 2 * B * L * E * (nt * F) + 2 * B * (nf * F) * C
    bytes_accessed = (ids.size * 4 + B * L * E * 4 + wcat.size * 2
                      + bconv.size * 4 + wfc.size * 2 + bfc.size * 4
                      + B * C * 4)

    return pl.pallas_call(
        textcnn_kernel,
        out_shape=jax.ShapeDtypeStruct((B, C), jnp.float32),
        grid_spec=pltpu.PrefetchScalarGridSpec(
            num_scalar_prefetch=1,                                # ids -> SMEM
            grid=(B // b_tile,),
            in_specs=[
                pl.BlockSpec(memory_space=pl.ANY),                # emb table (HBM)
                pl.BlockSpec((E, nt * F), lambda i, ids: (0, 0)), # fused conv W
                pl.BlockSpec((1, nf * F), lambda i, ids: (0, 0)), # conv bias
                pl.BlockSpec((nf * F, C), lambda i, ids: (0, 0)), # fc W
                pl.BlockSpec((1, C), lambda i, ids: (0, 0)),      # fc bias
            ],
            out_specs=pl.BlockSpec((b_tile, C), lambda i, ids: (i, 0)),
            scratch_shapes=[
                pltpu.VMEM((b_tile * L, E), jnp.float32),         # gathered emb
                pltpu.SemaphoreType.DMA,
            ]),
        compiler_params=pltpu.CompilerParams(
            dimension_semantics=("parallel",)),
        cost_estimate=pl.CostEstimate(
            flops=flops, transcendentals=0, bytes_accessed=bytes_accessed),
    )(ids, table, wcat, bconv, wfc, bfc)


def textcnn_ref(x_tokens, params):
    """Pure-JAX f32 reference for correctness checking."""
    emb = params["embedding"][x_tokens].astype(jnp.float32)
    pooled = []
    for k, (w, b) in zip(FILTER_SIZES, params["convs"]):
        L = emb.shape[1]
        T = L - k + 1
        windows = jnp.stack([emb[:, t:t + k, :] for t in range(T)], axis=1)
        conv = jnp.einsum("btke,kef->btf", windows, w) + b
        conv = jax.nn.relu(conv)
        pooled.append(jnp.max(conv, axis=1))
    feat = jnp.concatenate(pooled, axis=-1)
    return feat @ params["wfc"] + params["bfc"]


def make_params(key, n_vocab, embed, num_filters, num_classes):
    keys = jax.random.split(key, 16)
    emb_table = 0.02 * jax.random.normal(keys[0], (n_vocab, embed), jnp.float32)
    emb_table = emb_table.at[0].set(0.0)          # padding_idx=0
    convs = []
    for i, k in enumerate(FILTER_SIZES):
        fan_in = k * embed
        w = jax.random.normal(keys[1 + i], (k, embed, num_filters),
                              jnp.float32) / math.sqrt(fan_in)
        b = 0.01 * jax.random.normal(keys[4 + i], (num_filters,), jnp.float32)
        convs.append((w, b))
    in_feat = num_filters * len(FILTER_SIZES)
    wfc = jax.random.normal(keys[7], (in_feat, num_classes),
                            jnp.float32) / math.sqrt(in_feat)
    bfc = 0.01 * jax.random.normal(keys[8], (num_classes,), jnp.float32)
    return {"embedding": emb_table, "convs": convs, "wfc": wfc, "bfc": bfc}


if __name__ == "__main__":
    # Small, hardware-friendly shapes consistent with the module's forward.
    # B=32, b_tile=16 -> BtL=256 per tile (fills v6e/v7x MXU M dim) and a
    # grid of (2,) so both v7x TensorCores get a tile.
    B, L = 32, 16               # batch, sequence length
    N_VOCAB = 512
    EMBED = 128
    NUM_FILTERS = 128
    NUM_CLASSES = 128

    key = jax.random.PRNGKey(0)
    pkey, xkey = jax.random.split(key)
    params = make_params(pkey, N_VOCAB, EMBED, NUM_FILTERS, NUM_CLASSES)
    x = jax.random.randint(xkey, (B, L), 0, N_VOCAB, dtype=jnp.int32)

    out = jax.block_until_ready(textcnn_forward(x, params))
    ref = jax.block_until_ready(textcnn_ref(x, params))

    if out.shape != (B, NUM_CLASSES):
        raise AssertionError(f"bad output shape {out.shape}")
    # conv / fc matmul inputs are bf16 (f32 accumulation) -> loosened tolerance
    if not jnp.allclose(out, ref, rtol=2e-2, atol=2e-2):
        err = float(jnp.max(jnp.abs(out - ref)))
        raise AssertionError(f"Pallas kernel mismatch vs JAX reference, max |d|={err}")

    print("KERNEL_OK")
</pallas_src>

<mosaic_0001>
module attributes {stable_mosaic.version = 11 : i64} {
  func.func @textcnn_kernel(%arg0: i32, %arg1: memref<512xi32, #tpu.memory_space<smem>>, %arg2: memref<512x128xf32, #tpu.memory_space<any>>, %arg3: memref<128x768xbf16, #tpu.memory_space<vmem>>, %arg4: memref<1x384xf32, #tpu.memory_space<vmem>>, %arg5: memref<384x128xbf16, #tpu.memory_space<vmem>>, %arg6: memref<1x128xf32, #tpu.memory_space<vmem>>, %arg7: memref<16x128xf32, #tpu.memory_space<vmem>>, %arg8: memref<256x128xf32, #tpu.memory_space<vmem>>, %arg9: memref<!tpu.dma_semaphore, #tpu.memory_space<semaphore_mem>>) attributes {dimension_semantics = [#tpu.dimension_semantics<parallel>], iteration_bounds = array<i64: 2>, scalar_prefetch = 1 : i64, scratch_operands = 2 : i64, tpu.core_type = #tpu.core_type<tc>, window_params = [{}, {pipeline_mode = #tpu.pipeline_mode<synchronous>, transform_indices = @transform_1, window_bounds = array<i64: 128, 768>}, {pipeline_mode = #tpu.pipeline_mode<synchronous>, transform_indices = @transform_2, window_bounds = array<i64: 1, 384>}, {pipeline_mode = #tpu.pipeline_mode<synchronous>, transform_indices = @transform_3, window_bounds = array<i64: 384, 128>}, {pipeline_mode = #tpu.pipeline_mode<synchronous>, transform_indices = @transform_4, window_bounds = array<i64: 1, 128>}, {transform_indices = @transform_5, window_bounds = array<i64: 16, 128>}]} {
    %c256_i32 = arith.constant 256 : i32
    %0 = arith.muli %arg0, %c256_i32 : i32
    %c0_i32 = arith.constant 0 : i32
    %c256_i32_0 = arith.constant 256 : i32
    %1 = arith.addi %c0_i32, %c256_i32_0 : i32
    %c1_i32 = arith.constant 1 : i32
    scf.for %arg10 = %c0_i32 to %1 step %c1_i32  : i32 {
      %65 = arith.addi %0, %arg10 : i32
      %66 = arith.index_cast %65 : i32 to index
      %67 = memref.load %arg1[%66] : memref<512xi32, #tpu.memory_space<smem>>
      %c0_i32_28 = arith.constant 0 : i32
      %68 = tpu.memref_slice %arg2[%67, %c0_i32_28] : memref<512x128xf32, #tpu.memory_space<any>> -> memref<1x128xf32, #tpu.memory_space<any>>
      %69 = tpu.memref_squeeze %68 : memref<1x128xf32, #tpu.memory_space<any>> -> memref<128xf32, #tpu.memory_space<any>>
      %c0_i32_29 = arith.constant 0 : i32
      %70 = tpu.memref_slice %arg8[%arg10, %c0_i32_29] : memref<256x128xf32, #tpu.memory_space<vmem>> -> memref<1x128xf32, #tpu.memory_space<vmem>>
      %71 = tpu.memref_squeeze %70 : memref<1x128xf32, #tpu.memory_space<vmem>> -> memref<128xf32, #tpu.memory_space<vmem>>
      tpu.enqueue_dma source(%69 : memref<128xf32, #tpu.memory_space<any>>) target(%71 : memref<128xf32, #tpu.memory_space<vmem>>) target_semaphore(%arg9 : memref<!tpu.dma_semaphore, #tpu.memory_space<semaphore_mem>>)
    }
    %c256_i32_1 = arith.constant 256 : i32
    %c0_i32_2 = arith.constant 0 : i32
    %c256_i32_3 = arith.constant 256 : i32
    %2 = arith.addi %c0_i32_2, %c256_i32_3 : i32
    %c1_i32_4 = arith.constant 1 : i32
    scf.for %arg10 = %c0_i32_2 to %2 step %c1_i32_4  : i32 {
      %c0_i32_28 = arith.constant 0 : i32
      %c0_i32_29 = arith.constant 0 : i32
      %65 = tpu.memref_slice %arg2[%c0_i32_28, %c0_i32_29] : memref<512x128xf32, #tpu.memory_space<any>> -> memref<1x128xf32, #tpu.memory_space<any>>
      %66 = tpu.memref_squeeze %65 : memref<1x128xf32, #tpu.memory_space<any>> -> memref<128xf32, #tpu.memory_space<any>>
      %c0_i32_30 = arith.constant 0 : i32
      %67 = tpu.memref_slice %arg8[%arg10, %c0_i32_30] : memref<256x128xf32, #tpu.memory_space<vmem>> -> memref<1x128xf32, #tpu.memory_space<vmem>>
      %68 = tpu.memref_squeeze %67 : memref<1x128xf32, #tpu.memory_space<vmem>> -> memref<128xf32, #tpu.memory_space<vmem>>
      tpu.wait_dma2 semaphore(%arg9 : memref<!tpu.dma_semaphore, #tpu.memory_space<semaphore_mem>>) src(%66 : memref<128xf32, #tpu.memory_space<any>>) dst(%68 : memref<128xf32, #tpu.memory_space<vmem>>)
    }
    %c256_i32_5 = arith.constant 256 : i32
    %c0 = arith.constant 0 : index
    %c0_6 = arith.constant 0 : index
    %3 = vector.load %arg8[%c0, %c0_6] : memref<256x128xf32, #tpu.memory_space<vmem>>, vector<256x128xf32>
    %4 = arith.truncf %3 : vector<256x128xf32> to vector<256x128xbf16>
    %c0_7 = arith.constant 0 : index
    %c0_8 = arith.constant 0 : index
    %5 = vector.load %arg3[%c0_7, %c0_8] : memref<128x768xbf16, #tpu.memory_space<vmem>>, vector<128x768xbf16>
    %cst = arith.constant dense<0.000000e+00> : vector<256x768xf32>
    %6 = tpu.matmul %4, %5, %cst {dimension_numbers = #tpu.dot_dimension_numbers<[1], [0], [0], [1], [0, 0, 1, 1], [], []>} : vector<256x128xbf16>, vector<128x768xbf16>, vector<256x768xf32> -> vector<256x768xf32>
    %c0_9 = arith.constant 0 : index
    %c0_10 = arith.constant 0 : index
    %7 = vector.load %arg4[%c0_9, %c0_10] : memref<1x384xf32, #tpu.memory_space<vmem>>, vector<1x384xf32>
    %8 = tpu.iota {dimensions = array<i32: 1>} : vector<16x16x128xi32>
    %9 = vector.extract_strided_slice %6 {offsets = [0, 0], sizes = [256, 128], strides = [1, 1]} : vector<256x768xf32> to vector<256x128xf32>
    %10 = vector.shape_cast %9 : vector<256x128xf32> to vector<16x16x128xf32>
    %11 = vector.extract_strided_slice %7 {offsets = [0, 0], sizes = [1, 128], strides = [1, 1]} : vector<1x384xf32> to vector<1x128xf32>
    %12 = vector.shape_cast %11 : vector<1x128xf32> to vector<1x1x128xf32>
    %13 = vector.broadcast %12 : vector<1x1x128xf32> to vector<16x16x128xf32>
    %14 = arith.addf %10, %13 : vector<16x16x128xf32>
    %cst_11 = arith.constant 0.000000e+00 : f32
    %15 = vector.broadcast %cst_11 : f32 to vector<16x16x128xf32>
    %16 = arith.maximumf %14, %15 : vector<16x16x128xf32>
    %c16_i32 = arith.constant 16 : i32
    %17 = vector.broadcast %c16_i32 : i32 to vector<16x16x128xi32>
    %18 = arith.cmpi slt, %8, %17 : vector<16x16x128xi32>
    %cst_12 = arith.constant -1.000000e+00 : f32
    %19 = vector.broadcast %cst_12 : f32 to vector<16x16x128xf32>
    %20 = arith.select %18, %16, %19 : vector<16x16x128xi1>, vector<16x16x128xf32>
    %cst_13 = arith.constant dense<0xFF800000> : vector<16x128xf32>
    %21 = vector.multi_reduction <maximumf>, %20, %cst_13 [1] : vector<16x16x128xf32> to vector<16x128xf32>
    %22 = vector.extract_strided_slice %6 {offsets = [0, 128], sizes = [256, 128], strides = [1, 1]} : vector<256x768xf32> to vector<256x128xf32>
    %23 = vector.extract_strided_slice %6 {offsets = [0, 256], sizes = [256, 128], strides = [1, 1]} : vector<256x768xf32> to vector<256x128xf32>
    %c255_i32 = arith.constant 255 : i32
    %24 = tpu.dynamic_rotate %23 by %c255_i32 dim 0 : vector<256x128xf32>, i32 -> vector<256x128xf32>
    %25 = arith.addf %22, %24 : vector<256x128xf32>
    %26 = vector.shape_cast %25 : vector<256x128xf32> to vector<16x16x128xf32>
    %27 = vector.extract_strided_slice %7 {offsets = [0, 128], sizes = [1, 128], strides = [1, 1]} : vector<1x384xf32> to vector<1x128xf32>
    %28 = vector.shape_cast %27 : vector<1x128xf32> to vector<1x1x128xf32>
    %29 = vector.broadcast %28 : vector<1x1x128xf32> to vector<16x16x128xf32>
    %30 = arith.addf %26, %29 : vector<16x16x128xf32>
    %cst_14 = arith.constant 0.000000e+00 : f32
    %31 = vector.broadcast %cst_14 : f32 to vector<16x16x128xf32>
    %32 = arith.maximumf %30, %31 : vector<16x16x128xf32>
    %c15_i32 = arith.constant 15 : i32
    %33 = vector.broadcast %c15_i32 : i32 to vector<16x16x128xi32>
    %34 = arith.cmpi slt, %8, %33 : vector<16x16x128xi32>
    %cst_15 = arith.constant -1.000000e+00 : f32
    %35 = vector.broadcast %cst_15 : f32 to vector<16x16x128xf32>
    %36 = arith.select %34, %32, %35 : vector<16x16x128xi1>, vector<16x16x128xf32>
    %cst_16 = arith.constant dense<0xFF800000> : vector<16x128xf32>
    %37 = vector.multi_reduction <maximumf>, %36, %cst_16 [1] : vector<16x16x128xf32> to vector<16x128xf32>
    %38 = vector.extract_strided_slice %6 {offsets = [0, 384], sizes = [256, 128], strides = [1, 1]} : vector<256x768xf32> to vector<256x128xf32>
    %39 = vector.extract_strided_slice %6 {offsets = [0, 512], sizes = [256, 128], strides = [1, 1]} : vector<256x768xf32> to vector<256x128xf32>
    %c255_i32_17 = arith.constant 255 : i32
    %40 = tpu.dynamic_rotate %39 by %c255_i32_17 dim 0 : vector<256x128xf32>, i32 -> vector<256x128xf32>
    %41 = arith.addf %38, %40 : vector<256x128xf32>
    %42 = vector.extract_strided_slice %6 {offsets = [0, 640], sizes = [256, 128], strides = [1, 1]} : vector<256x768xf32> to vector<256x128xf32>
    %c254_i32 = arith.constant 254 : i32
    %43 = tpu.dynamic_rotate %42 by %c254_i32 dim 0 : vector<256x128xf32>, i32 -> vector<256x128xf32>
    %44 = arith.addf %41, %43 : vector<256x128xf32>
    %45 = vector.shape_cast %44 : vector<256x128xf32> to vector<16x16x128xf32>
    %46 = vector.extract_strided_slice %7 {offsets = [0, 256], sizes = [1, 128], strides = [1, 1]} : vector<1x384xf32> to vector<1x128xf32>
    %47 = vector.shape_cast %46 : vector<1x128xf32> to vector<1x1x128xf32>
    %48 = vector.broadcast %47 : vector<1x1x128xf32> to vector<16x16x128xf32>
    %49 = arith.addf %45, %48 : vector<16x16x128xf32>
    %cst_18 = arith.constant 0.000000e+00 : f32
    %50 = vector.broadcast %cst_18 : f32 to vector<16x16x128xf32>
    %51 = arith.maximumf %49, %50 : vector<16x16x128xf32>
    %c14_i32 = arith.constant 14 : i32
    %52 = vector.broadcast %c14_i32 : i32 to vector<16x16x128xi32>
    %53 = arith.cmpi slt, %8, %52 : vector<16x16x128xi32>
    %cst_19 = arith.constant -1.000000e+00 : f32
    %54 = vector.broadcast %cst_19 : f32 to vector<16x16x128xf32>
    %55 = arith.select %53, %51, %54 : vector<16x16x128xi1>, vector<16x16x128xf32>
    %cst_20 = arith.constant dense<0xFF800000> : vector<16x128xf32>
    %56 = vector.multi_reduction <maximumf>, %55, %cst_20 [1] : vector<16x16x128xf32> to vector<16x128xf32>
    %57 = tpu.concatenate %21, %37, %56 in 1 : vector<16x128xf32>, vector<16x128xf32>, vector<16x128xf32> -> vector<16x384xf32>
    %58 = arith.truncf %57 : vector<16x384xf32> to vector<16x384xbf16>
    %c0_21 = arith.constant 0 : index
    %c0_22 = arith.constant 0 : index
    %59 = vector.load %arg5[%c0_21, %c0_22] : memref<384x128xbf16, #tpu.memory_space<vmem>>, vector<384x128xbf16>
    %cst_23 = arith.constant dense<0.000000e+00> : vector<16x128xf32>
    %60 = tpu.matmul %58, %59, %cst_23 {dimension_numbers = #tpu.dot_dimension_numbers<[1], [0], [0], [1], [0, 0, 1, 1], [], []>} : vector<16x384xbf16>, vector<384x128xbf16>, vector<16x128xf32> -> vector<16x128xf32>
    %c0_24 = arith.constant 0 : index
    %c0_25 = arith.constant 0 : index
    %61 = vector.load %arg6[%c0_24, %c0_25] : memref<1x128xf32, #tpu.memory_space<vmem>>, vector<1x128xf32>
    %62 = vector.broadcast %61 : vector<1x128xf32> to vector<16x128xf32>
    %63 = arith.addf %60, %62 : vector<16x128xf32>
    %c0_26 = arith.constant 0 : index
    %c0_27 = arith.constant 0 : index
    %64 = vector.load %arg7[%c0_26, %c0_27] : memref<16x128xf32, #tpu.memory_space<vmem>>, vector<16x128xf32>
    tpu.vector_store %arg7[%c0_26, %c0_27], %63 {strides = array<i32>} : memref<16x128xf32, #tpu.memory_space<vmem>>, vector<16x128xf32>,
    return
  }
  func.func @transform_1(%arg0: i32, %arg1: memref<512xi32, #tpu.memory_space<smem>>) -> (i32, i32) {
    %c0_i32 = arith.constant 0 : i32
    %c0_i32_0 = arith.constant 0 : i32
    %c0_i32_1 = arith.constant 0 : i32
    return %c0_i32, %c0_i32_0 : i32, i32
  }
  func.func @transform_2(%arg0: i32, %arg1: memref<512xi32, #tpu.memory_space<smem>>) -> (i32, i32) {
    %c0_i32 = arith.constant 0 : i32
    %c0_i32_0 = arith.constant 0 : i32
    %c0_i32_1 = arith.constant 0 : i32
    return %c0_i32, %c0_i32_0 : i32, i32
  }
  func.func @transform_3(%arg0: i32, %arg1: memref<512xi32, #tpu.memory_space<smem>>) -> (i32, i32) {
    %c0_i32 = arith.constant 0 : i32
    %c0_i32_0 = arith.constant 0 : i32
    %c0_i32_1 = arith.constant 0 : i32
    return %c0_i32, %c0_i32_0 : i32, i32
  }
  func.func @transform_4(%arg0: i32, %arg1: memref<512xi32, #tpu.memory_space<smem>>) -> (i32, i32) {
    %c0_i32 = arith.constant 0 : i32
    %c0_i32_0 = arith.constant 0 : i32
    %c0_i32_1 = arith.constant 0 : i32
    return %c0_i32, %c0_i32_0 : i32, i32
  }
  func.func @transform_5(%arg0: i32, %arg1: memref<512xi32, #tpu.memory_space<smem>>) -> (i32, i32) {
    %c0_i32 = arith.constant 0 : i32
    %c0_i32_0 = arith.constant 0 : i32
    return %arg0, %c0_i32 : i32, i32
  }
}

</mosaic_0001>

<bundles_post_ra>
// kernel: tpu_custom_call.1
= control target key start
LH: loop header
LB: loop body
LE: loop exit
PB: predicated region body
PF: predicated region fallthrough
CT: control target
= control target key end

     0   :  { %s4497_s0 = inlined_call_operand.hbm [shape: s32[512], index: 0, kind: input, shape index: {}]   ;;  %s4498_s1 = inlined_call_operand.hbm [shape: f32[512,128], index: 1, kind: input, shape index: {}]   ;;  %s4499_s2 = inlined_call_operand.hbm [shape: bf16[128,768], index: 2, kind: input, shape index: {}]   ;;  %s4500_s3 = inlined_call_operand.vmem [shape: f32[1,384], index: 3, kind: input, shape index: {}]   ;;  %s4501_s4 = inlined_call_operand.hbm [shape: bf16[384,128], index: 4, kind: input, shape index: {}]   ;;  %s4502_s5 = inlined_call_operand.vmem [shape: f32[1,128], index: 5, kind: input, shape index: {}]   ;;  %s4503_s6 = inlined_call_operand.hbm [shape: f32[32,128], index: 6, kind: output, shape index: {}]  }
   0x1   :  { %4513 = sst [smem:[#allocation46_spill]] %s4499_s2  ;;  %s2935_s23 = scalar_lea.hbm %s4497_s0, 64 }
   0x2   :  { %p2936_p0 = scmp.ne.s32.totalorder %s4497_s0, %s2935_s23  ;;  %p2939_p1 = scmp.lt.u32.totalorder %s2935_s23, %s4497_s0 }
   0x4   :  { %p2941_p2 = pnand %p2939_p1, %p2936_p0 }
   0x6   :  { %2944 = shalt.err (!%p2941_p2)  }
   0x7   :  { %s3117_s28 = smov [#allocation5]  }
   0x8   :  { %12 = dma.hbm_to_smem %s4497_s0, 64, %s3117_s28, [#allocation4] }
   0x9   :  { %3077 = dma.done.wait [#allocation4], 64 }
   0xa   :  { %3078 = vsyncadd [#allocation4], 4294967232 }
   0xb   :  { %14 = sfence }
   0xc   :  { %15 = vsyncpa [#allocation7], 0 }
   0xd   :  { %16 = vsyncpa [#allocation10], 0 }
   0xe   :  { %17 = vsyncpa [#allocation8], 0 }
   0xf   :  { %19 = vsyncpa [#allocation8 + $0x1], 0  ;;  %s3178_s7 = smov 0   ;;  %s3180_s8 = smov 0  }
  0x10   :  { %s3182_s9 = smov 0   ;;  %s3184_s10 = smov 0  }
  0x11 LB: > { %s3199_s0 = sadd.s32 4294967295, %s3107_s10   ;;  %s2596_s11 = sadd.s32 4294967294, %s3107_s10   ;;  %s3107_s10 = sphi %s3184_s10, %s4594_s10   ;;  %s3103_s9 = sphi %s3182_s9, %s4593_s9   ;;  %s3099_s8 = sphi %s3180_s8, %s4592_s8   ;;  %s3095_s7 = sphi %s3178_s7, %s4591_s7  }
  0x12   : > { %s3203_s12 = sadd.s32 1, %s3107_s10   ;;  %s116_s13 = sadd.s32 1, %s3103_s9 }
  0x13   : > { %s113_s14 = ssub.s32 %s3107_s10, %s3203_s12  ;;  %p126_p3 = scmp.ne.s32.totalorder %s3103_s9, %s3099_s8 }
  0x14   : > { %p114_p4 = scmp.eq.s32.totalorder %s113_s14, 0  ;;  %p127_p5 = scmp.eq.s32.totalorder %s3199_s0, 1 }
  0x15   : > { %p132_p6 = scmp.ne.s32.totalorder %s3099_s8, %s3095_s7  ;;  %p133_p7 = scmp.eq.s32.totalorder %s2596_s11, 1 }
  0x16   : > { %s3214_s15 = scalar_select %p114_p4, %s3103_s9, %s116_s13  }
  0x17   : > { %p3216_p8 = por %p127_p5, %p126_p3  ;;  %p3220_p9 = por %p133_p7, %p132_p6 }
  0x18   : > { %p2597_p10 = scmp.ge.s32.totalorder %s3107_s10, 1  ;;  %p140_p11 = scmp.lt.s32.totalorder %s3107_s10, 3 }
  0x19   : > { %s4514_s16 = scalar_select %p3216_p8, 1, 0 }
  0x1a   : > { %s4515_s17 = scalar_select %p3220_p9, 1, 0 }
  0x1b   : > { %p4504_p12 = scmp.eq.s32.totalorder %s3199_s0, 0  ;;  %p3227_p13 = pnand %p2597_p10, %p140_p11 }
  0x1c   : > { %s3118_s19 = smov [#allocation6]   ;;  %s3119_s22 = smov [#allocation9]  }
  0x1d   : > { %s4516_s18 = scalar_select %p3227_p13, 1, 0 }
  0x1e   : > { %s152_s20 = sshll.u32 %s3118_s19, 4  ;;  %p2763_p0 = pneg %p3227_p13  ;;  %s153_s20 = int_to_ptr.vmem [resolvable:$true] %s152_s20 }
  0x1f   : > { %s168_s23 = sshll.u32 %s3119_s22, 4  ;;  %s4518_s2 = sld [smem:[#allocation46_spill]]  ;;  %s3239_s23 = int_to_ptr.vmem [resolvable:$true] %s168_s23 }
  0x20   : > { %p3235_p1 = pnand %p4504_p12, %p2763_p0 }
  0x22   : > { %p2947_p3 = pneg %p3235_p1 }
  0x25   : > { %s2945_s26 = scalar_lea.hbm %s4518_s2, 6144 }
  0x26   : > { %p2946_p2 = scmp.ne.s32.totalorder %s4518_s2, %s2945_s26  ;;  %p2952_p6 = scmp.lt.u32.totalorder %s2945_s26, %s4518_s2 }
  0x28   : > { %p2948_p4 = pnand %p2947_p3, %p2946_p2 }
  0x2a   : > { %p2949_p5 = pneg %p2948_p4 }
  0x2c   : > { %p2954_p7 = pnand %p2952_p6, %p2949_p5 }
  0x2e   : > { %2957 = shalt.err (!%p2954_p7)
}
  0x2f   : > { %s2958_s11 = scalar_lea.vmem %s153_s20, 6144  ;;  %p2966_p12 = scmp.lt.s32.totalorder %s153_s20, %s153_s20 }
  0x30   : > { %p2959_p10 = scmp.ne.s32.totalorder %s153_s20, %s2958_s11  ;;  %p2967_p9 = scmp.lt.s32.totalorder %s2958_s11, %s2958_s11 }
  0x32   : > { %p2961_p11 = pnand %p2959_p10, %p2947_p3  ;;  %p2968_p8 = por %p2967_p9, %p2966_p12 }
  0x34   : > { %p2962_p0 = pneg %p2961_p11 }
  0x36   : > { %p2969_p13 = pnand %p2968_p8, %p2962_p0 }
  0x38   : > { %2972 = shalt.err (!%p2969_p13)
}
  0x39   : > { %s3120_s13 = smov 384   ;;  %s3121_s14 = smov 24  }
  0x3a   : > { %2766 = dma.hbm_to_vmem [thread:$0]  (!%p3235_p1), %s4518_s2, 6144, %s153_s20, [#allocation7], %s3120_s13, %s3120_s13, %s3121_s14  }
  0x3b   : > { %s2973_s26 = scalar_lea.hbm %s4501_s4, 3072 }
  0x3c   : > { %p2974_p2 = scmp.ne.s32.totalorder %s4501_s4, %s2973_s26  ;;  %p2980_p12 = scmp.lt.u32.totalorder %s2973_s26, %s4501_s4 }
  0x3e   : > { %p2976_p8 = pnand %p2974_p2, %p2947_p3 }
  0x40   : > { %p2977_p9 = pneg %p2976_p8 }
  0x42   : > { %p2982_p13 = pnand %p2980_p12, %p2977_p9 }
  0x44   : > { %2985 = shalt.err (!%p2982_p13)
}
  0x45   : > { %s2986_s20 = scalar_lea.vmem %s3239_s23, 3072  ;;  %p2994_p7 = scmp.lt.s32.totalorder %s3239_s23, %s3239_s23 }
  0x46   : > { %p2987_p4 = scmp.ne.s32.totalorder %s3239_s23, %s2986_s20  ;;  %p2995_p10 = scmp.lt.s32.totalorder %s2986_s20, %s2986_s20 }
  0x48   : > { %p2989_p5 = pnand %p2987_p4, %p2947_p3  ;;  %p2996_p11 = por %p2995_p10, %p2994_p7 }
  0x4a   : > { %p2990_p6 = pneg %p2989_p5 }
  0x4c   : > { %p2997_p0 = pnand %p2996_p11, %p2990_p6 }
  0x4e   : > { %3000 = shalt.err (!%p2997_p0)
}
  0x4f   : > { %s3122_s11 = smov 64   ;;  %s3123_s13 = smov 4  }
  0x50   : > { %2769 = dma.hbm_to_vmem [thread:$0]  (!%p3235_p1), %s4501_s4, 3072, %s3239_s23, [#allocation10], %s3122_s11, %s3122_s11, %s3123_s13  }
  0x51   : > { %p4519_p2 = scmp.ne.s32.totalorder %s4516_s18, 0 }
  0x53   : > { %187 = sbr.rel (%p4519_p2) target bundleno = 878 (0x36e), region = 36 }
  0x5a   : > { %p4520_p3 = scmp.eq.s32.totalorder %s3199_s0, 0 }
  0x5c   : > { %3080 = dma.done.wait (%p4520_p3), [#allocation7], 6144   ;;  %p4521_p8 = pmov %p4520_p3 }
  0x5d   : > { %p4522_p9 = pmov %p4520_p3 }
  0x5e   : > { %3082 = vsyncadd (%p4521_p8), [#allocation7], 4294961152 }
  0x5f   : > { %3084 = dma.done.wait (%p4522_p9), [#allocation10], 3072   ;;  %p4523_p12 = pmov %p4520_p3 }
  0x60   : > { %s4507_s21 = sand.u32 1, %s3099_s8   ;;  %s2604_s23 = sshll.u32 %s3199_s0, 8 }
  0x61   : > { %3086 = vsyncadd (%p4523_p12), [#allocation10], 4294964224  ;;  %s2603_s18 = sshll.u32 %s4507_s21, 4  ;;  %s3304_s24 = smov 0  }
  0x62   : > { %s3302_s22 = scalar_lea.vmem [#allocation11], %s2603_s18 }
  0x63 LB: >> { %s221_s25 = sadd.s32 %s3111_s24, %s2604_s23  ;;  %s225_s27 = scalar_lea.vmem [#allocation2], %s3111_s24  ;;  %s3111_s24 = sphi %s3304_s24, %s220_s24  }
  0x64   : >> { %s222_s26 = sld [smem:[#allocation5 + %s221_s25]]  ;;  %s233_s28 = sshll.u32 %s225_s27, 4  ;;  %s234_s28 = int_to_ptr.vmem [resolvable:$true] %s233_s28 }
  0x65   : >> { %s3003_s18 = scalar_lea.hbm %s4498_s1, 8192 }
  0x6a   : >> { %s2605_s29 = sshll.u32 %s222_s26, 4 }
  0x6b   : >> { %s224_s11 = scalar_lea.hbm %s4498_s1, %s2605_s29 }
  0x6c   : >> { %s3001_s13 = scalar_lea.hbm %s224_s11, 16  ;;  %p3004_p13 = scmp.lt.u32.totalorder %s224_s11, %s4498_s1 }
  0x6d   : >> { %p3002_p1 = scmp.ne.s32.totalorder %s224_s11, %s3001_s13  ;;  %p3005_p4 = scmp.lt.u32.totalorder %s3003_s18, %s3001_s13 }
  0x6e   : >> { %p3007_p6 = scmp.lt.u32.totalorder %s3001_s13, %s224_s11 }
  0x6f   : >> { %p3006_p5 = por %p3005_p4, %p3004_p13 }
  0x71   : >> { %p3008_p7 = por %p3007_p6, %p3006_p5 }
  0x73   : >> { %p3009_p10 = pnand %p3008_p7, %p3002_p1 }
  0x75   : >> { %3012 = shalt.err (!%p3009_p10)  }
  0x76   : >> { %s3013_s25 = scalar_lea.vmem %s234_s28, 16  ;;  %s3124_s26 = smov [#allocation2]  }
  0x77   : >> { %p3014_p11 = scmp.ne.s32.totalorder %s234_s28, %s3013_s25  ;;  %s3015_s27 = sshll.u32 %s3124_s26, 4  ;;  %s3016_s27 = int_to_ptr.vmem [resolvable:$false] %s3015_s27 }
  0x78   : >> { %s3017_s29 = scalar_lea.vmem %s3016_s27, 4096  ;;  %p3018_p0 = scmp.lt.s32.totalorder %s234_s28, %s3016_s27 }
  0x79   : >> { %p3019_p2 = scmp.lt.s32.totalorder %s3017_s29, %s3013_s25 }
  0x7b   : >> { %p3020_p3 = por %p3019_p2, %p3018_p0 }
  0x7d   : >> { %p3021_p8 = pnand %p3020_p3, %p3014_p11 }
  0x7f   : >> { %3024 = shalt.err (!%p3021_p8)  }
  0x80   : >> { %236 = dma.hbm_to_vmem [thread:$0]  %s224_s11, 16, %s234_s28, [#allocation3] }
  0x81   : >> { %s220_s24 = sadd.s32 1, %s3111_s24  }
  0x82   : >> { %p217_p9 = scmp.ge.s32.totalorder %s220_s24, 256  }
  0x83   : > { %s3113_s2 = smov (%p217_p9), 0  }
  0x84   : > { %219 = sbr.rel (!%p217_p9) target bundleno = 99 (0x63), region = 97 }
  0x8b LB: >> { %3087 = dma.done.wait [#allocation3], 16  ;;  %s3115_s2 = sphi %s3113_s2, %s242_s2  }
  0x8c   : >> { %3088 = vsyncadd [#allocation3], 4294967280  ;;  %s242_s2 = sadd.s32 1, %s3115_s2  }
  0x8d   : >> { %p239_p12 = scmp.ge.s32.totalorder %s242_s2, 256  }
  0x8e   : > { %v2839_v0 = vld [vmem:[#allocation6 + $0x4] ss:$24 sps:$4 sm:$0xff] (%p239_p12)   ;;  %v2841_v1 = vld [vmem:[#allocation6] ss:$24 sps:$4 sm:$0xff] (%p239_p12)   ;;  %v3125_v2 = vmov (%p239_p12), 0   ;;  %v246_v18 = vld [vmem:[#allocation2 + $0x8] sm:$0xff] (%p239_p12)  ;;  %s4448_s14 = scalar_lea.hbm (%p239_p12), %s4503_s6, %s2604_s23 }
  0x8f   : > { %241 = sbr.rel (!%p239_p12) target bundleno = 139 (0x8b), region = 108  ;;  %613 = vmatprep.mubr.bf16.mxu0 (%p239_p12), %v3125_v2  ;;  %723 = vmatprep.mubr.bf16.mxu1 (%p239_p12), %v3125_v2  ;;  %v2842_v3 = vld [vmem:[#allocation6 + $0x34] ss:$24 sps:$4 sm:$0xff] (%p239_p12)   ;;  %v2844_v4 = vld [vmem:[#allocation6 + $0x30] ss:$24 sps:$4 sm:$0xff] (%p239_p12)   ;;  %v245_v17 = vld [vmem:[#allocation2] sm:$0xff] (%p239_p12) }
  0x90   : > { %581 = vmatprep.subr.bf16.mxu0 (%p239_p12), %v2839_v0  ;;  %2737 = vmatprep.subr.bf16.mxu1 (%p239_p12), %v2839_v0  ;;  %v2845_v5 = vld [vmem:[#allocation6 + $0x64] ss:$24 sps:$4 sm:$0xff] (%p239_p12)   ;;  %v2847_v6 = vld [vmem:[#allocation6 + $0x60] ss:$24 sps:$4 sm:$0xff] (%p239_p12)   ;;  %v2848_v7 = vld [vmem:[#allocation6 + $0x94] ss:$24 sps:$4 sm:$0xff] (%p239_p12)   ;;  %v3327_v23 = vpack.c.bf16 (%p239_p12), %v246_v18, %v245_v17 }
  0x91   : > { %582 = vmatpush1.bf16.msra.mxu0 (%p239_p12), %v2841_v1  ;;  %2745 = vmatpush1.bf16.msra.mxu1 (%p239_p12), %v2841_v1  ;;  %v2850_v8 = vld [vmem:[#allocation6 + $0x90] ss:$24 sps:$4 sm:$0xff] (%p239_p12)   ;;  %v2851_v9 = vld [vmem:[#allocation6 + $0xc4] ss:$24 sps:$4 sm:$0xff] (%p239_p12)   ;;  %v2853_v10 = vld [vmem:[#allocation6 + $0xc0] ss:$24 sps:$4 sm:$0xff] (%p239_p12)  }
  0x92   : > { %583 = vmatprep.subr.bf16.mxu0 (%p239_p12), %v2842_v3  ;;  %2738 = vmatprep.subr.bf16.mxu1 (%p239_p12), %v2842_v3  ;;  %v2854_v11 = vld [vmem:[#allocation6 + $0xf4] ss:$24 sps:$4 sm:$0xff] (%p239_p12)   ;;  %v2856_v12 = vld [vmem:[#allocation6 + $0xf0] ss:$24 sps:$4 sm:$0xff] (%p239_p12)   ;;  %v2857_v13 = vld [vmem:[#allocation6 + $0x124] ss:$24 sps:$4 sm:$0xff] (%p239_p12)  }
  0x93   : > { %v2859_v14 = vld [vmem:[#allocation6 + $0x120] ss:$24 sps:$4 sm:$0xff] (%p239_p12)   ;;  %v2860_v15 = vld [vmem:[#allocation6 + $0x154] ss:$24 sps:$4 sm:$0xff] (%p239_p12)   ;;  %v2862_v16 = vld [vmem:[#allocation6 + $0x150] ss:$24 sps:$4 sm:$0xff] (%p239_p12)  }
  0x94   : > { %v267_v19 = vld [vmem:[#allocation2 + $0xb0] sm:$0xff] (%p239_p12)  ;;  %v268_v20 = vld [vmem:[#allocation2 + $0xb8] sm:$0xff] (%p239_p12)  ;;  %v2868_v22 = vld [vmem:[#allocation6 + $0xc] ss:$24 sps:$4 sm:$0xff] (%p239_p12)   ;;  %vm2118_vm0 = vcmask (%p239_p12), 1041409   ;;  %vm2120_vm1 = vcmask (%p239_p12), 1042434  }
  0x95   : > { %584 = vmatpush1.bf16.msra.mxu0 (%p239_p12), %v2844_v4  ;;  %2746 = vmatpush1.bf16.msra.mxu1 (%p239_p12), %v2844_v4  ;;  %v2865_v21 = vld [vmem:[#allocation6 + $0x14] ss:$24 sps:$4 sm:$0xff] (%p239_p12)   ;;  %v3329_v24 = vpack.c.bf16 (%p239_p12), %v268_v20, %v267_v19  ;;  %v2863_v25 = vld [vmem:[#allocation6 + $0x10] ss:$24 sps:$4 sm:$0xff] (%p239_p12)   ;;  %v248_v28 = vld [vmem:[#allocation2 + $0x18] sm:$0xff] (%p239_p12)  ;;  %vm2122_vm2 = vcmask (%p239_p12), 1043459  }
  0x96   : > { %585 = vmatprep.subr.bf16.mxu0 %v2845_v5  ;;  %2739 = vmatprep.subr.bf16.mxu1 %v2845_v5  ;;  %v2866_v26 = vld [vmem:[#allocation6 + $0x8] ss:$24 sps:$4 sm:$0xff]   ;;  %v247_v27 = vld [vmem:[#allocation2 + $0x10] sm:$0xff]  ;;  %v2871_v29 = vld [vmem:[#allocation6 + $0x44] ss:$24 sps:$4 sm:$0xff]   ;;  %vm2124_vm4 = vcmask 1044484  }
  0x97   : > { %v2874_v30 = vld [vmem:[#allocation6 + $0x3c] ss:$24 sps:$4 sm:$0xff]   ;;  %v269_v31 = vld [vmem:[#allocation2 + $0xc0] sm:$0xff]  ;;  %v270_v32 = vld [vmem:[#allocation2 + $0xc8] sm:$0xff]  ;;  %v3335_v37 = vpack.c.bf16 %v248_v28, %v247_v27  ;;  %vm2126_vm6 = vcmask 1045509   ;;  %vm2128_vm7 = vcmask 1046534  }
  0x98   : > { %v2869_v33 = vld [vmem:[#allocation6 + $0x40] ss:$24 sps:$4 sm:$0xff]   ;;  %v2883_v35 = vld [vmem:[#allocation6 + $0x74] ss:$24 sps:$4 sm:$0xff]   ;;  %v3337_v38 = vpack.c.bf16 %v270_v32, %v269_v31  ;;  %v2881_v40 = vld [vmem:[#allocation6 + $0x70] ss:$24 sps:$4 sm:$0xff]  }
  0x99   : > { %586 = vmatpush1.bf16.msra.mxu0 %v2847_v6  ;;  %2747 = vmatpush1.bf16.msra.mxu1 %v2847_v6  ;;  %v2872_v34 = vld [vmem:[#allocation6 + $0x38] ss:$24 sps:$4 sm:$0xff]   ;;  %v2877_v36 = vld [vmem:[#allocation6 + $0x6c] ss:$24 sps:$4 sm:$0xff]   ;;  %v2875_v39 = vld [vmem:[#allocation6 + $0x68] ss:$24 sps:$4 sm:$0xff]  }
  0x9a   : > { %587 = vmatprep.subr.bf16.mxu0 %v2848_v7  ;;  %2740 = vmatprep.subr.bf16.mxu1 %v2848_v7  ;;  %v249_v41 = vld [vmem:[#allocation2 + $0x20] sm:$0xff]  ;;  %v250_v42 = vld [vmem:[#allocation2 + $0x28] sm:$0xff]  ;;  %v271_v43 = vld [vmem:[#allocation2 + $0xd0] sm:$0xff]  ;;  %vm2130_vm8 = vcmask 1047559   ;;  %vm3127_vm11 = vmmov 0   ;;  %s2505_s20 = sshll.u32 %s3302_s22, 4  ;;  %s4451_s20 = int_to_ptr.vmem [resolvable:$true] %s2505_s20 }
  0x9b   : > { %v272_v44 = vld [vmem:[#allocation2 + $0xd8] sm:$0xff]  ;;  %v2886_v49 = vld [vmem:[#allocation6 + $0xcc] ss:$24 sps:$4 sm:$0xff]   ;;  %v3343_v51 = vpack.c.bf16 %v250_v42, %v249_v41  ;;  %v2884_v53 = vld [vmem:[#allocation6 + $0xc8] ss:$24 sps:$4 sm:$0xff]   ;;  %s4588_s19 = sand.u32 1, %s3099_s8  }
  0x9c   : > { %v2880_v45 = vld [vmem:[#allocation6 + $0x9c] ss:$24 sps:$4 sm:$0xff]   ;;  %v2878_v47 = vld [vmem:[#allocation6 + $0x98] ss:$24 sps:$4 sm:$0xff]   ;;  %v3345_v52 = vpack.c.bf16 %v272_v44, %v271_v43  ;;  %v273_v59 = vld [vmem:[#allocation2 + $0xe0] sm:$0xff]  ;;  %s4456_s18 = scalar_lea.sflag [#allocation8], %s4588_s19 }
  0x9d   : > { %588 = vmatpush1.bf16.msra.mxu0 %v2850_v8  ;;  %2748 = vmatpush1.bf16.msra.mxu1 %v2850_v8  ;;  %v2895_v46 = vld [vmem:[#allocation6 + $0xa4] ss:$24 sps:$4 sm:$0xff]   ;;  %v2893_v48 = vld [vmem:[#allocation6 + $0xa0] ss:$24 sps:$4 sm:$0xff]   ;;  %v2901_v50 = vld [vmem:[#allocation6 + $0xd4] ss:$24 sps:$4 sm:$0xff]  }
  0x9e   : > { %589 = vmatprep.subr.bf16.mxu0 %v2851_v9  ;;  %2741 = vmatprep.subr.bf16.mxu1 %v2851_v9  ;;  %v2899_v54 = vld [vmem:[#allocation6 + $0xd0] ss:$24 sps:$4 sm:$0xff]   ;;  %v2889_v55 = vld [vmem:[#allocation6 + $0xfc] ss:$24 sps:$4 sm:$0xff]   ;;  %v2902_v62 = vld [vmem:[#allocation6 + $0x100] ss:$24 sps:$4 sm:$0xff]  }
  0x9f   : > { %v2904_v56 = vld [vmem:[#allocation6 + $0x104] ss:$24 sps:$4 sm:$0xff]   ;;  %v251_v57 = vld [vmem:[#allocation2 + $0x30] sm:$0xff]  ;;  %v274_v60 = vld [vmem:[#allocation2 + $0xe8] sm:$0xff]  ;;  %s3025_s25 = scalar_lea.vmem %s4451_s20, 256  ;;  %p4589_p13 = scmp.ne.s32.totalorder %s4514_s16, 0 }
  0xa0   : > { %v252_v58 = vld [vmem:[#allocation2 + $0x38] sm:$0xff]  ;;  %v2892_v63 = vld [vmem:[#allocation6 + $0x12c] ss:$24 sps:$4 sm:$0xff]   ;;  %v3353_v3 = vpack.c.bf16 %v274_v60, %v273_v59  ;;  %v2890_v4 = vld [vmem:[#allocation6 + $0x128] ss:$24 sps:$4 sm:$0xff]   ;;  %p3026_p1 = scmp.ne.s32.totalorder %s4451_s20, %s3025_s25  ;;  %s3128_s0 = smov [#allocation11]  }
  0xa1   : > { %590 = vmatpush1.bf16.msra.mxu0 %v2853_v10  ;;  %2749 = vmatpush1.bf16.msra.mxu1 %v2853_v10  ;;  %v2887_v61 = vld [vmem:[#allocation6 + $0xf8] ss:$24 sps:$4 sm:$0xff]   ;;  %v2907_v0 = vld [vmem:[#allocation6 + $0x134] ss:$24 sps:$4 sm:$0xff]   ;;  %v3351_v1 = vpack.c.bf16 %v252_v58, %v251_v57  ;;  %v2910_v7 = vld [vmem:[#allocation6 + $0x164] ss:$24 sps:$4 sm:$0xff]  }
  0xa2   : > { %591 = vmatprep.subr.bf16.mxu0 %v2854_v11  ;;  %2742 = vmatprep.subr.bf16.mxu1 %v2854_v11  ;;  %v2905_v5 = vld [vmem:[#allocation6 + $0x130] ss:$24 sps:$4 sm:$0xff]   ;;  %v2898_v6 = vld [vmem:[#allocation6 + $0x15c] ss:$24 sps:$4 sm:$0xff]   ;;  %v253_v8 = vld [vmem:[#allocation2 + $0x40] sm:$0xff]  ;;  %p3027_p4 = pnand %p3026_p1, %p4589_p13  ;;  %s3029_s23 = sshll.u32 %s3128_s0, 4  ;;  %s3030_s23 = int_to_ptr.vmem [resolvable:$false] %s3029_s23 }
  0xa3   : > { %v254_v9 = vld [vmem:[#allocation2 + $0x48] sm:$0xff]  ;;  %v275_v10 = vld [vmem:[#allocation2 + $0xf0] sm:$0xff]  ;;  %v276_v11 = vld [vmem:[#allocation2 + $0xf8] sm:$0xff]  ;;  %s3031_s26 = scalar_lea.vmem %s3030_s23, 512  ;;  %p3032_p6 = scmp.lt.s32.totalorder %s4451_s20, %s3030_s23 }
  0xa4   : > { %v256_v17 = vld [vmem:[#allocation2 + $0x58] sm:$0xff]  ;;  %v257_v19 = vld [vmem:[#allocation2 + $0x60] sm:$0xff]  ;;  %v258_v20 = vld [vmem:[#allocation2 + $0x68] sm:$0xff]  ;;  %p3028_p5 = pneg %p3027_p4  ;;  %p3033_p7 = scmp.lt.s32.totalorder %s3031_s26, %s3025_s25 }
  0xa5   : > { %592 = vmatpush1.bf16.msra.mxu0 %v2856_v12  ;;  %2750 = vmatpush1.bf16.msra.mxu1 %v2856_v12  ;;  %v2896_v12 = vld [vmem:[#allocation6 + $0x158] ss:$24 sps:$4 sm:$0xff]   ;;  %v261_v27 = vld [vmem:[#allocation2 + $0x80] sm:$0xff]  ;;  %v262_v28 = vld [vmem:[#allocation2 + $0x88] sm:$0xff] }
  0xa6   : > { %593 = vmatprep.subr.bf16.mxu0 %v2857_v13  ;;  %2743 = vmatprep.subr.bf16.mxu1 %v2857_v13  ;;  %v2908_v13 = vld [vmem:[#allocation6 + $0x160] ss:$24 sps:$4 sm:$0xff]   ;;  %v2914_v41 = vld [vmem:[#allocation9 + $0x8] sm:$0xff]   ;;  %p3034_p10 = por %p3033_p7, %p3032_p6 }
  0xa7   : > { %v264_v31 = vld [vmem:[#allocation2 + $0x98] sm:$0xff] }
  0xa8   : > { %p3035_p11 = pnand %p3034_p10, %p3028_p5 }
  0xa9   : > { %594 = vmatpush1.bf16.msra.mxu0 %v2859_v14  ;;  %2751 = vmatpush1.bf16.msra.mxu1 %v2859_v14  ;;  %v3359_v14 = vpack.c.bf16 %v254_v9, %v253_v8 }
  0xaa   : > { %595 = vmatprep.subr.bf16.mxu0 %v2860_v15  ;;  %2744 = vmatprep.subr.bf16.mxu1 %v2860_v15  ;;  %v3361_v15 = vpack.c.bf16 %v276_v11, %v275_v10 }
  0xad   : > { %596 = vmatpush1.bf16.msra.mxu0 %v2862_v16  ;;  %2752 = vmatpush1.bf16.msra.mxu1 %v2862_v16  ;;  %v255_v16 = vld [vmem:[#allocation2 + $0x50] sm:$0xff] }
  0xae   : > { %967 = vmatprep.subr.bf16.mxu0 %v2865_v21  ;;  %774 = vmatprep.subr.bf16.mxu1 %v2868_v22  ;;  %v282_v18 = vpack.c.bf16 %v256_v17, %v255_v16  ;;  %v283_v21 = vpack.c.bf16 %v258_v20, %v257_v19  ;;  %v259_v22 = vld [vmem:[#allocation2 + $0x70] sm:$0xff] }
  0xaf   : > { %v2916_v16 = vld [vmem:[#allocation9 + $0x10] sm:$0xff]  }
  0xb0   : > { %614 = vmatmul.mubr.bf16.vlgmr.msra.gmra.mrb[0].mxu0 %v3327_v23  ;;  %724 = vmatmul.mubr.bf16.vlgmr.msra.gmra.mrb[0].mxu1 %v3329_v24 }
  0xb1   : > { %968 = vmatpush1.bf16.msra.mxu0 %v2863_v25  ;;  %623 = vmatprep.mubr.bf16.mxu0 %v3125_v2  ;;  %v260_v25 = vld [vmem:[#allocation2 + $0x78] sm:$0xff] }
  0xb2   : > { %733 = vmatprep.mubr.bf16.mxu1 %v3125_v2  ;;  %775 = vmatpush1.bf16.msra.mxu1 %v2866_v26  ;;  %v284_v26 = vpack.c.bf16 %v260_v25, %v259_v22 }
  0xb3   : > { %969 = vmatprep.subr.bf16.mxu0 %v2871_v29  ;;  %776 = vmatprep.subr.bf16.mxu1 %v2874_v30  ;;  %v285_v29 = vpack.c.bf16 %v262_v28, %v261_v27  ;;  %v263_v30 = vld [vmem:[#allocation2 + $0x90] sm:$0xff] }
  0xb4   : > { %v286_v32 = vpack.c.bf16 %v264_v31, %v263_v30 }
  0xb5   : > { %970 = vmatpush1.bf16.msra.mxu0 %v2869_v33  ;;  %v265_v33 = vld [vmem:[#allocation2 + $0xa0] sm:$0xff] }
  0xb6   : > { %777 = vmatpush1.bf16.msra.mxu1 %v2872_v34  ;;  %971 = vmatprep.subr.bf16.mxu0 %v2883_v35  ;;  %v266_v34 = vld [vmem:[#allocation2 + $0xa8] sm:$0xff] }
  0xb7   : > { %778 = vmatprep.subr.bf16.mxu1 %v2877_v36  ;;  %v287_v35 = vpack.c.bf16 %v266_v34, %v265_v33  ;;  %v2912_v36 = vld [vmem:[#allocation9] sm:$0xff]  }
  0xb8   : > { %624 = vmatmul.mubr.bf16.gmra.mrb[4].mxu0 %v3335_v37  ;;  %734 = vmatmul.mubr.bf16.gmra.mrb[4].mxu1 %v3337_v38 }
  0xb9   : > { %633 = vmatprep.mubr.bf16.mxu0 %v3125_v2  ;;  %743 = vmatprep.mubr.bf16.mxu1 %v3125_v2 }
  0xba   : > { %779 = vmatpush1.bf16.msra.mxu1 %v2875_v39  ;;  %972 = vmatpush1.bf16.msra.mxu0 %v2881_v40  ;;  %v2913_v40 = vld [vmem:[#allocation9 + $0x48] sm:$0xff]  }
  0xbb   : > { %780 = vmatprep.subr.bf16.mxu1 %v2880_v45  ;;  %973 = vmatprep.subr.bf16.mxu0 %v2895_v46 }
  0xbe   : > { %781 = vmatpush1.bf16.msra.mxu1 %v2878_v47  ;;  %974 = vmatpush1.bf16.msra.mxu0 %v2893_v48 }
  0xbf   : > { %782 = vmatprep.subr.bf16.mxu1 %v2886_v49  ;;  %975 = vmatprep.subr.bf16.mxu0 %v2901_v50 }
  0xc0   : > { %634 = vmatmul.mubr.bf16.gmra.mrb[8].mxu0 %v3343_v51  ;;  %744 = vmatmul.mubr.bf16.gmra.mrb[8].mxu1 %v3345_v52 }
  0xc1   : > { %643 = vmatprep.mubr.bf16.mxu0 %v3125_v2  ;;  %753 = vmatprep.mubr.bf16.mxu1 %v3125_v2 }
  0xc2   : > { %783 = vmatpush1.bf16.msra.mxu1 %v2884_v53  ;;  %976 = vmatpush1.bf16.msra.mxu0 %v2899_v54 }
  0xc3   : > { %784 = vmatprep.subr.bf16.mxu1 %v2889_v55  ;;  %977 = vmatprep.subr.bf16.mxu0 %v2904_v56 }
  0xc6   : > { %785 = vmatpush1.bf16.msra.mxu1 %v2887_v61  ;;  %978 = vmatpush1.bf16.msra.mxu0 %v2902_v62 }
  0xc7   : > { %786 = vmatprep.subr.bf16.mxu1 %v2892_v63  ;;  %979 = vmatprep.subr.bf16.mxu0 %v2907_v0 }
  0xc8   : > { %644 = vmatmul.mubr.bf16.gmra.mrb[12].mxu0 %v3351_v1  ;;  %754 = vmatmul.mubr.bf16.gmra.mrb[12].mxu1 %v3353_v3 }
  0xc9   : > { %653 = vmatprep.mubr.bf16.mxu0 %v3125_v2  ;;  %763 = vmatprep.mubr.bf16.mxu1 %v3125_v2 }
  0xca   : > { %787 = vmatpush1.bf16.msra.mxu1 %v2890_v4  ;;  %980 = vmatpush1.bf16.msra.mxu0 %v2905_v5 }
  0xcb   : > { %788 = vmatprep.subr.bf16.mxu1 %v2898_v6  ;;  %981 = vmatprep.subr.bf16.mxu0 %v2910_v7 }
  0xce   : > { %789 = vmatpush1.bf16.msra.mxu1 %v2896_v12  ;;  %982 = vmatpush1.bf16.msra.mxu0 %v2908_v13 }
  0xd0   : > { %654 = vmatmul.mubr.bf16.gmra.mrb[16].mxu0 %v3359_v14  ;;  %764 = vmatmul.mubr.bf16.gmra.mrb[16].mxu1 %v3361_v15 }
  0xd1   : > { %663 = vmatprep.mubr.bf16.mxu0 %v3125_v2  ;;  %806 = vmatprep.mubr.bf16.mxu1 %v3125_v2 }
  0xd8   : > { %664 = vmatmul.mubr.bf16.gmra.mrb[20].mxu0 %v282_v18  ;;  %807 = vmatmul.mubr.bf16.vlgmr.msra.gmra.mrb[20].mxu1 %v3327_v23 }
  0xd9   : > { %673 = vmatprep.mubr.bf16.mxu0 %v3125_v2  ;;  %816 = vmatprep.mubr.bf16.mxu1 %v3125_v2 }
  0xe0   : > { %674 = vmatmul.mubr.bf16.gmra.mrb[24].mxu0 %v283_v21  ;;  %817 = vmatmul.mubr.bf16.gmra.mrb[24].mxu1 %v3335_v37 }
  0xe1   : > { %683 = vmatprep.mubr.bf16.mxu0 %v3125_v2  ;;  %826 = vmatprep.mubr.bf16.mxu1 %v3125_v2 }
  0xe8   : > { %684 = vmatmul.mubr.bf16.gmra.mrb[28].mxu0 %v284_v26  ;;  %827 = vmatmul.mubr.bf16.gmra.mrb[28].mxu1 %v3343_v51 }
  0xe9   : > { %693 = vmatprep.mubr.bf16.mxu0 %v3125_v2  ;;  %836 = vmatprep.mubr.bf16.mxu1 %v3125_v2 }
  0xf0   : > { %694 = vmatmul.mubr.bf16.gmra.mrb[32].mxu0 %v285_v29  ;;  %837 = vmatmul.mubr.bf16.gmra.mrb[32].mxu1 %v3351_v1 }
  0xf1   : > { %703 = vmatprep.mubr.bf16.mxu0 %v3125_v2  ;;  %846 = vmatprep.mubr.bf16.mxu1 %v3125_v2 }
  0xf8   : > { %704 = vmatmul.mubr.bf16.gmra.mrb[36].mxu0 %v286_v32  ;;  %847 = vmatmul.mubr.bf16.gmra.mrb[36].mxu1 %v3359_v14 }
  0xf9   : > { %713 = vmatprep.mubr.bf16.mxu0 %v3125_v2  ;;  %856 = vmatprep.mubr.bf16.mxu1 %v3125_v2 }
 0x100   : > { %714 = vmatmul.mubr.bf16.gmra.mrb[40].mxu0 %v287_v35  ;;  %857 = vmatmul.mubr.bf16.gmra.mrb[40].mxu1 %v282_v18 }
 0x101   : > { %866 = vmatprep.mubr.bf16.mxu1 %v3125_v2  ;;  %999 = vmatprep.mubr.bf16.mxu0 %v3125_v2 }
 0x108   : > { %867 = vmatmul.mubr.bf16.gmra.mrb[44].mxu1 %v283_v21  ;;  %1000 = vmatmul.mubr.bf16.vlgmr.msra.gmra.mrb[44].mxu0 %v3327_v23  ;;  %v2911_v23 = vld [vmem:[#allocation9 + $0x40] sm:$0xff]  }
 0x109   : > { %876 = vmatprep.mubr.bf16.mxu1 %v3125_v2  ;;  %1009 = vmatprep.mubr.bf16.mxu0 %v3125_v2 }
 0x10a   : > { %2686 = vmatprep.subr.bf16.mxu1 %v2911_v23 }
 0x10b   : > { %2687 = vmatpush3.bf16.msra.mxu1 %v2912_v36 }
 0x10c   : > { %2688 = vmatprep.subr.bf16.mxu1 %v2913_v40 }
 0x10f   : > { %2689 = vmatpush3.bf16.msra.mxu1 %v2914_v41 }
 0x110   : > { %877 = vmatmul.mubr.bf16.gmra.mrb[48].mxu1 %v284_v26  ;;  %1010 = vmatmul.mubr.bf16.gmra.mrb[48].mxu0 %v3335_v37  ;;  %v1161_v37 = vlaneseq }
 0x111   : > { %886 = vmatprep.mubr.bf16.mxu1 %v3125_v2  ;;  %1019 = vmatprep.mubr.bf16.mxu0 %v3125_v2 }
 0x112   : > { %v3421_v39 = vshrl.u32 %v1161_v37, 7 }
 0x114   : > { %vm1412_vm3 = vcmp.lt.s32.totalorder %v3421_v39, 7  ;;  %vm1821_vm9 = vcmp.lt.s32.totalorder %v3421_v39, 6 }
 0x118   : > { %887 = vmatmul.mubr.bf16.gmra.mrb[52].mxu1 %v285_v29  ;;  %1020 = vmatmul.mubr.bf16.gmra.mrb[52].mxu0 %v3343_v51 }
 0x119   : > { %896 = vmatprep.mubr.bf16.mxu1 %v3125_v2  ;;  %1029 = vmatprep.mubr.bf16.mxu0 %v3125_v2 }
 0x120   : > { %897 = vmatmul.mubr.bf16.gmra.mrb[56].mxu1 %v286_v32  ;;  %1030 = vmatmul.mubr.bf16.gmra.mrb[56].mxu0 %v3351_v1 }
 0x121   : > { %906 = vmatprep.mubr.bf16.mxu1 %v3125_v2  ;;  %1039 = vmatprep.mubr.bf16.mxu0 %v3125_v2 }
 0x128   : > { %907 = vmatmul.mubr.bf16.gmra.mrb[60].mxu1 %v287_v35  ;;  %1040 = vmatmul.mubr.bf16.gmra.mrb[60].mxu0 %v3359_v14 }
 0x129   : > { %916 = vmatprep.mubr.bf16.mxu1 %v3125_v2  ;;  %1049 = vmatprep.mubr.bf16.mxu0 %v3125_v2 }
 0x130   : > { %917 = vmatmul.mubr.bf16.gmra.mrb[64].mxu1 %v3329_v24  ;;  %1050 = vmatmul.mubr.bf16.gmra.mrb[64].mxu0 %v282_v18 }
 0x131   : > { %926 = vmatprep.mubr.bf16.mxu1 %v3125_v2  ;;  %1059 = vmatprep.mubr.bf16.mxu0 %v3125_v2 }
 0x138   : > { %927 = vmatmul.mubr.bf16.gmra.mrb[68].mxu1 %v3337_v38  ;;  %1060 = vmatmul.mubr.bf16.gmra.mrb[68].mxu0 %v283_v21 }
 0x139   : > { %936 = vmatprep.mubr.bf16.mxu1 %v3125_v2  ;;  %1069 = vmatprep.mubr.bf16.mxu0 %v3125_v2 }
 0x140   : > { %937 = vmatmul.mubr.bf16.gmra.mrb[72].mxu1 %v3345_v52  ;;  %1070 = vmatmul.mubr.bf16.gmra.mrb[72].mxu0 %v284_v26 }
 0x141   : > { %946 = vmatprep.mubr.bf16.mxu1 %v3125_v2  ;;  %1079 = vmatprep.mubr.bf16.mxu0 %v3125_v2 }
 0x148   : > { %947 = vmatmul.mubr.bf16.gmra.mrb[76].mxu1 %v3353_v3  ;;  %1080 = vmatmul.mubr.bf16.gmra.mrb[76].mxu0 %v285_v29 }
 0x149   : > { %956 = vmatprep.mubr.bf16.mxu1 %v3125_v2  ;;  %1089 = vmatprep.mubr.bf16.mxu0 %v3125_v2 }
 0x150   : > { %957 = vmatmul.mubr.bf16.gmra.mrb[80].mxu1 %v3361_v15  ;;  %1090 = vmatmul.mubr.bf16.gmra.mrb[80].mxu0 %v286_v32 }
 0x151   : > { %1099 = vmatprep.mubr.bf16.mxu0 %v3125_v2 }
 0x158   : > { %1100 = vmatmul.mubr.bf16.gmra.mrb[84].mxu0 %v287_v35 }
 0x159   : > { %1109 = vmatprep.mubr.bf16.mxu0 %v3125_v2 }
 0x160   : > { %1110 = vmatmul.mubr.bf16.gmra.mrb[88].mxu0 %v3329_v24  ;;  %v3425_v24 = vsub.s32 0, %v3421_v39 }
 0x161   : > { %1119 = vmatprep.mubr.bf16.mxu0 %v3125_v2 }
 0x168   : > { %1120 = vmatmul.mubr.bf16.gmra.mrb[92].mxu0 %v3337_v38  ;;  %v3430_v38 = vld [vmem:[%s4500_s3] sm:$0x7] }
 0x169   : > { %1129 = vmatprep.mubr.bf16.mxu0 %v3125_v2  ;;  %v3435_v42 = vrot.slane %v3430_v38, %v3425_v24 }
 0x170   : > { %1130 = vmatmul.mubr.bf16.gmra.mrb[96].mxu0 %v3345_v52 }
 0x171   : > { %1139 = vmatprep.mubr.bf16.mxu0 %v3125_v2 }
 0x178   : > { %1140 = vmatmul.mubr.bf16.gmra.mrb[100].mxu0 %v3353_v3 }
 0x179   : > { %1149 = vmatprep.mubr.bf16.mxu0 %v3125_v2 }
 0x180   : > { %1150 = vmatmul.mubr.bf16.gmra.mrb[104].mxu0 %v3361_v15  ;;  %v2915_v15 = vld [vmem:[#allocation9 + $0x50] sm:$0xff]  }
 0x181   : > { %2690 = vmatprep.subr.bf16.mxu1 %v2915_v15 }
 0x182   : > { %2691 = vmatpush3.bf16.msra.mxu1 %v2916_v16 }
 0x183   : > { %v615_v43 = vpop.f32.mrb[0].mxu0  ;;  %v725_v2 = vpop.f32.mrb[0].mxu1 }
 0x184   : > { %v1170_v44 = vadd.f32 %v3435_v42, %v615_v43  ;;  %v3438_v45 = vpop.f32.mrb[1].mxu0  ;;  %v1192_v46 = vadd.f32 %v3435_v42, %v725_v2  ;;  %v3441_v47 = vpop.f32.mrb[1].mxu1 }
 0x185   : > { %v619_v48 = vpop.f32.mrb[2].mxu0  ;;  %v729_v49 = vpop.f32.mrb[2].mxu1 }
 0x186   : > { %v1171_v50 = vadd.f32 %v3435_v42, %v619_v48  ;;  %v3444_v51 = vpop.f32.mrb[3].mxu0  ;;  %v1224_v52 = vmax.f32 %v1192_v46, 0.0  ;;  %v1193_v53 = vadd.f32 %v3435_v42, %v729_v49  ;;  %v3447_v54 = vpop.f32.mrb[3].mxu1  ;;  %v1202_v55 = vmax.f32 %v1170_v44, 0.0 }
 0x188   : > { %v1203_v56 = vmax.f32 %v1171_v50, 0.0  ;;  %v1225_v57 = vmax.f32 %v1193_v53, 0.0 }
 0x18a   : > { %v1268_v58 = vmax.f32 %v1202_v55, %v1203_v56  ;;  %v3449_v59 = vmax.f32 %v1224_v52, %v1225_v57 }
 0x18b   : > { %v625_v60 = vpop.f32.mrb[4].mxu0  ;;  %v735_v61 = vpop.f32.mrb[4].mxu1 }
 0x18c   : > { %v1269_v62 = vrot.slane %v1268_v58, 4  ;;  %v1172_v63 = vadd.f32 %v3435_v42, %v625_v60  ;;  %v3452_v0 = vpop.f32.mrb[5].mxu0  ;;  %v1194_v1 = vadd.f32 %v3435_v42, %v735_v61  ;;  %v3455_v3 = vpop.f32.mrb[5].mxu1 }
 0x18d   : > { %4524 = vst [vmem:[#allocation21_spill] sm:$0xff] %v3455_v3  ;;  %v629_v4 = vpop.f32.mrb[6].mxu0  ;;  %v739_v5 = vpop.f32.mrb[6].mxu1 }
 0x18e   : > { %v1270_v6 = vmax.f32 %v1268_v58, %v1269_v62  ;;  %v1173_v7 = vadd.f32 %v3435_v42, %v629_v4  ;;  %v3458_v8 = vpop.f32.mrb[7].mxu0  ;;  %v3460_v9 = vpop.f32.mrb[7].mxu1  ;;  %v1226_v10 = vmax.f32 %v1194_v1, 0.0  ;;  %v1195_v11 = vadd.f32 %v3435_v42, %v739_v5 }
 0x18f   : > { %4525 = vst [vmem:[#allocation22_spill] sm:$0xff] %v3460_v9  ;;  %v1204_v12 = vmax.f32 %v1172_v63, 0.0 }
 0x190   : > { %v1205_v13 = vmax.f32 %v1173_v7, 0.0  ;;  %v1227_v14 = vmax.f32 %v1195_v11, 0.0  ;;  %v1271_v17 = vrot.slane %v1270_v6, 2 }
 0x192   : > { %v1275_v18 = vmax.f32 %v1204_v12, %v1205_v13  ;;  %v3463_v20 = vmax.f32 %v1226_v10, %v1227_v14  ;;  %v1272_v31 = vmax.f32 %v1270_v6, %v1271_v17 }
 0x193   : > { %v635_v19 = vpop.f32.mrb[8].mxu0  ;;  %v745_v21 = vpop.f32.mrb[8].mxu1 }
 0x194   : > { %v1276_v22 = vrot.slane %v1275_v18, 4  ;;  %v3465_v25 = vpop.f32.mrb[9].mxu0  ;;  %v3467_v26 = vpop.f32.mrb[9].mxu1  ;;  %v1174_v27 = vadd.f32 %v3435_v42, %v635_v19  ;;  %v1196_v29 = vadd.f32 %v3435_v42, %v745_v21  ;;  %v1273_v2 = vrot.slane %v1272_v31, 1 }
 0x195   : > { %4526 = vst [vmem:[#allocation23_spill] sm:$0xff] %v3467_v26  ;;  %v639_v28 = vpop.f32.mrb[10].mxu0  ;;  %v749_v30 = vpop.f32.mrb[10].mxu1 }
 0x196   : > { %v1277_v32 = vmax.f32 %v1275_v18, %v1276_v22  ;;  %v3471_v33 = vpop.f32.mrb[11].mxu0  ;;  %v3473_v34 = vpop.f32.mrb[11].mxu1  ;;  %v1175_v35 = vadd.f32 %v3435_v42, %v639_v28  ;;  %v1228_v23 = vmax.f32 %v1196_v29, 0.0  ;;  %v1197_v36 = vadd.f32 %v3435_v42, %v749_v30 }
 0x197   : > { %4527 = vst [vmem:[#allocation24_spill] sm:$0xff] %v3473_v34  ;;  %v1206_v40 = vmax.f32 %v1174_v27, 0.0  ;;  %v1274_v62 = vmax.f32 %v1272_v31, %v1273_v2  ;;  %v1346_v31 = vrot.slane %v3449_v59, 4  ;;  %v2918_v2 = vld [vmem:[#allocation9 + $0x18] sm:$0xff]  }
 0x198   : > { %v1278_v37 = vrot.slane %v1277_v32, 2  ;;  %v1207_v41 = vmax.f32 %v1175_v35, 0.0  ;;  %v1229_v43 = vmax.f32 %v1197_v36, 0.0 }
 0x19a   : > { %v1279_v44 = vmax.f32 %v1277_v32, %v1278_v37  ;;  %v1282_v46 = vmax.f32 %v1206_v40, %v1207_v41  ;;  %v3477_v49 = vmax.f32 %v1228_v23, %v1229_v43  ;;  %v2917_v43 = vld [vmem:[#allocation9 + $0x58] sm:$0xff]  }
 0x19b   : > { %v645_v48 = vpop.f32.mrb[12].mxu0  ;;  %v755_v50 = vpop.f32.mrb[12].mxu1  ;;  %2692 = vmatprep.subr.bf16.mxu1 %v2917_v43 }
 0x19c   : > { %v1280_v52 = vrot.slane %v1279_v44, 1  ;;  %v1176_v53 = vadd.f32 %v3435_v42, %v645_v48  ;;  %v3480_v55 = vpop.f32.mrb[13].mxu0  ;;  %v1198_v56 = vadd.f32 %v3435_v42, %v755_v50  ;;  %v3483_v57 = vpop.f32.mrb[13].mxu1  ;;  %v1283_v58 = vrot.slane %v1282_v46, 4  ;;  %2693 = vmatpush3.bf16.msra.mxu1 %v2918_v2 }
 0x19d   : > { %4528 = vst [vmem:[#allocation25_spill] sm:$0xff] %v3483_v57  ;;  %v649_v60 = vpop.f32.mrb[14].mxu0  ;;  %v759_v61 = vpop.f32.mrb[14].mxu1 }
 0x19e   : > { %v1281_v63 = vmax.f32 %v1279_v44, %v1280_v52  ;;  %v1177_v1 = vadd.f32 %v3435_v42, %v649_v60  ;;  %v3486_v4 = vpop.f32.mrb[15].mxu0  ;;  %v3488_v5 = vpop.f32.mrb[15].mxu1  ;;  %v1284_v6 = vmax.f32 %v1282_v46, %v1283_v58  ;;  %v1230_v7 = vmax.f32 %v1198_v56, 0.0 }
 0x19f   : > { %4529 = vst [vmem:[#allocation26_spill] sm:$0xff] %v3488_v5  ;;  %v1199_v10 = vadd.f32 %v3435_v42, %v759_v61  ;;  %v1208_v12 = vmax.f32 %v1176_v53, 0.0  ;;  %v1347_v56 = vmax.f32 %v3449_v59, %v1346_v31 }
 0x1a0   : > { %v2119_v11 = vsel %vm2118_vm0, %v1281_v63, %v1274_v62  ;;  %v1209_v13 = vmax.f32 %v1177_v1, 0.0  ;;  %v1285_v14 = vrot.slane %v1284_v6, 2  ;;  %v1353_v63 = vrot.slane %v3463_v20, 4 }
 0x1a1   : > { %v1231_v15 = vmax.f32 %v1199_v10, 0.0  ;;  %v1360_v1 = vrot.slane %v3477_v49, 4 }
 0x1a2   : > { %v1289_v16 = vmax.f32 %v1208_v12, %v1209_v13  ;;  %v1286_v17 = vmax.f32 %v1284_v6, %v1285_v14 }
 0x1a3   : > { %v655_v18 = vpop.f32.mrb[16].mxu0  ;;  %v3492_v19 = vmax.f32 %v1230_v7, %v1231_v15  ;;  %v765_v21 = vpop.f32.mrb[16].mxu1  ;;  %v1348_v15 = vrot.slane %v1347_v56, 2 }
 0x1a4   : > { %v1290_v22 = vrot.slane %v1289_v16, 4  ;;  %v1178_v27 = vadd.f32 %v3435_v42, %v655_v18  ;;  %v3495_v28 = vpop.f32.mrb[17].mxu0  ;;  %v1200_v29 = vadd.f32 %v3435_v42, %v765_v21  ;;  %v3498_v30 = vpop.f32.mrb[17].mxu1  ;;  %v1287_v32 = vrot.slane %v1286_v17, 1 }
 0x1a5   : > { %4530 = vst [vmem:[#allocation27_spill] sm:$0xff] %v3498_v30  ;;  %v659_v35 = vpop.f32.mrb[18].mxu0  ;;  %v769_v23 = vpop.f32.mrb[18].mxu1 }
 0x1a6   : > { %v1291_v36 = vmax.f32 %v1289_v16, %v1290_v22  ;;  %v1179_v37 = vadd.f32 %v3435_v42, %v659_v35  ;;  %v3502_v40 = vpop.f32.mrb[19].mxu0  ;;  %v3504_v41 = vpop.f32.mrb[19].mxu1  ;;  %v1288_v44 = vmax.f32 %v1286_v17, %v1287_v32  ;;  %v1232_v46 = vmax.f32 %v1200_v29, 0.0 }
 0x1a7   : > { %4531 = vst [vmem:[#allocation28_spill] sm:$0xff] %v3504_v41  ;;  %v1201_v48 = vadd.f32 %v3435_v42, %v769_v23  ;;  %v1210_v52 = vmax.f32 %v1178_v27, 0.0  ;;  %v1354_v32 = vmax.f32 %v3463_v20, %v1353_v63  ;;  %v1361_v35 = vmax.f32 %v3477_v49, %v1360_v1 }
 0x1a8   : > { %v1292_v50 = vrot.slane %v1291_v36, 2  ;;  %v1211_v53 = vmax.f32 %v1179_v37, 0.0  ;;  %v2121_v58 = vsel %vm2120_vm1, %v1288_v44, %v2119_v11  ;;  %v1367_v49 = vrot.slane %v3492_v19, 4 }
 0x1a9   : > { %v1233_v60 = vmax.f32 %v1201_v48, 0.0 }
 0x1aa   : > { %v1293_v61 = vmax.f32 %v1291_v36, %v1292_v50  ;;  %v1296_v62 = vmax.f32 %v1210_v52, %v1211_v53  ;;  %v1477_v36 = vrot.slane %v3430_v38, 1  ;;  %v3536_v50 = vadd.s32 8, %v3421_v39 }
 0x1ab   : > { %v3511_v6 = vmax.f32 %v1232_v46, %v1233_v60  ;;  %v665_v7 = vpop.f32.mrb[20].mxu0  ;;  %v3513_v10 = vpop.f32.mrb[20].mxu1  ;;  %v1349_v46 = vmax.f32 %v1347_v56, %v1348_v15  ;;  %v1355_v60 = vrot.slane %v1354_v32, 2 }
 0x1ac   : > { %4532 = vst [vmem:[#allocation29_spill] sm:$0xff] %v3513_v10  ;;  %v1294_v12 = vrot.slane %v1293_v61, 1  ;;  %v1297_v13 = vrot.slane %v1296_v62, 4  ;;  %v1180_v14 = vadd.f32 %v3435_v42, %v665_v7  ;;  %v3516_v59 = vpop.f32.mrb[21].mxu0  ;;  %v3518_v11 = vpop.f32.mrb[21].mxu1  ;;  %v4508_v16 = vrot.slane %v3513_v10, 1 }
 0x1ad   : > { %v669_v17 = vpop.f32.mrb[22].mxu0  ;;  %v812_v18 = vpop.f32.mrb[22].mxu1  ;;  %vm1548_vm5 = vcmp.lt.s32.totalorder %v3536_v50, 15  ;;  %vm1957_vm10 = vcmp.lt.s32.totalorder %v3536_v50, 14 }
 0x1ae   : > { %v1295_v21 = vmax.f32 %v1293_v61, %v1294_v12  ;;  %v1298_v22 = vmax.f32 %v1296_v62, %v1297_v13  ;;  %v1181_v27 = vadd.f32 %v3435_v42, %v669_v17  ;;  %v3523_v29 = vpop.f32.mrb[23].mxu0  ;;  %v3525_v31 = vpop.f32.mrb[23].mxu1  ;;  %v1381_v23 = vrot.slane %v812_v18, 1 }
 0x1af   : > { %v1212_v2 = vmax.f32 %v1180_v14, 0.0  ;;  %v1362_v62 = vrot.slane %v1361_v35, 2  ;;  %v1886_v17 = vrot.slane %v3430_v38, 2  ;;  %v1350_v18 = vrot.slane %v1349_v46, 1 }
 0x1b0   : > { %v2123_v37 = vsel %vm2122_vm2, %v1295_v21, %v2121_v58  ;;  %v1299_v43 = vrot.slane %v1298_v22, 2  ;;  %v1213_v44 = vmax.f32 %v1181_v27, 0.0  ;;  %v1443_v48 = vsel %vm1412_vm3, %v4508_v16, %v1381_v23  ;;  %v2920_v16 = vld [vmem:[#allocation9 + $0x20] sm:$0xff]  }
 0x1b1   : > { %v1445_v53 = vadd.f32 %v1443_v48, %v3438_v45  ;;  %v3541_v58 = vrot.slane %v1477_v36, %v3425_v24  ;;  %v1363_v41 = vmax.f32 %v1361_v35, %v1362_v62  ;;  %v3565_v35 = vmax.f32 %v1349_v46, %v1350_v18 }
 0x1b2   : > { %v1300_v20 = vmax.f32 %v1298_v22, %v1299_v43  ;;  %v1303_v52 = vmax.f32 %v1212_v2, %v1213_v44  ;;  %v1368_v22 = vmax.f32 %v3492_v19, %v1367_v49  ;;  %v1356_v2 = vmax.f32 %v1354_v32, %v1355_v60 }
 0x1b3   : > { %v675_v61 = vpop.f32.mrb[24].mxu0  ;;  %v818_v56 = vpop.f32.mrb[24].mxu1  ;;  %v1483_v49 = vadd.f32 %v3541_v58, %v1445_v53  ;;  %v3568_v53 = vrot.slane %v1886_v17, %v3425_v24  ;;  %v1374_v24 = vrot.slane %v3511_v6, 4 }
 0x1b4   : > { %v1301_v63 = vrot.slane %v1300_v20, 1  ;;  %v1304_v1 = vrot.slane %v1303_v52, 4  ;;  %v3543_v7 = vpop.f32.mrb[25].mxu0  ;;  %v3545_v12 = vpop.f32.mrb[25].mxu1  ;;  %v1182_v13 = vadd.f32 %v3435_v42, %v675_v61  ;;  %v1382_v14 = vrot.slane %v818_v56, 1  ;;  %v2919_v56 = vld [vmem:[#allocation9 + $0x60] sm:$0xff]  }
 0x1b5   : > { %v679_v45 = vpop.f32.mrb[26].mxu0  ;;  %v822_v15 = vpop.f32.mrb[26].mxu1  ;;  %2694 = vmatprep.subr.bf16.mxu1 %v2919_v56 }
 0x1b6   : > { %v1302_v21 = vmax.f32 %v1300_v20, %v1301_v63  ;;  %v1305_v27 = vmax.f32 %v1303_v52, %v1304_v1  ;;  %v3551_v36 = vpop.f32.mrb[27].mxu0  ;;  %v3553_v43 = vpop.f32.mrb[27].mxu1  ;;  %v1442_v44 = vsel %vm1412_vm3, %v1381_v23, %v1382_v14  ;;  %v1183_v48 = vadd.f32 %v3435_v42, %v679_v45  ;;  %2695 = vmatpush3.bf16.msra.mxu1 %v2920_v16 }
 0x1b7   : > { %v1383_v61 = vrot.slane %v822_v15, 1  ;;  %v1446_v19 = vadd.f32 %v1442_v44, %v3444_v51  ;;  %v1214_v52 = vmax.f32 %v1182_v13, 0.0  ;;  %v1369_v23 = vrot.slane %v1368_v22, 2 }
 0x1b8   : > { %v2125_v38 = vsel %vm2124_vm4, %v1302_v21, %v2123_v37  ;;  %v1306_v20 = vrot.slane %v1305_v27, 2  ;;  %v1215_v63 = vmax.f32 %v1183_v48, 0.0  ;;  %v1357_v13 = vrot.slane %v1356_v2, 1 }
 0x1b9   : > { %v1441_v32 = vsel %vm1412_vm3, %v1382_v14, %v1383_v61  ;;  %v1484_v1 = vadd.f32 %v3541_v58, %v1446_v19  ;;  %v1364_v15 = vrot.slane %v1363_v41, 1  ;;  %v1515_v48 = vmax.f32 %v1483_v49, 0.0 }
 0x1ba   : > { %v1307_v60 = vmax.f32 %v1305_v27, %v1306_v20  ;;  %v1447_v45 = vadd.f32 %v1441_v32, %v3452_v0  ;;  %v1310_v37 = vmax.f32 %v1214_v52, %v1215_v63  ;;  %v3575_v20 = vmax.f32 %v1368_v22, %v1369_v23 }
 0x1bb   : > { %v685_v51 = vpop.f32.mrb[28].mxu0  ;;  %v828_v62 = vpop.f32.mrb[28].mxu1  ;;  %v1516_v21 = vmax.f32 %v1484_v1, 0.0  ;;  %v3590_v5 = vmax.f32 %v1356_v2, %v1357_v13 }
 0x1bc   : > { %v1308_v14 = vrot.slane %v1307_v60, 1  ;;  %v3570_v44 = vpop.f32.mrb[29].mxu0  ;;  %v3572_v27 = vpop.f32.mrb[29].mxu1  ;;  %v1311_v0 = vrot.slane %v1310_v37, 4  ;;  %v1184_v16 = vadd.f32 %v3435_v42, %v685_v51  ;;  %v1384_v46 = vrot.slane %v828_v62, 1 }
 0x1bd   : > { %v689_v18 = vpop.f32.mrb[30].mxu0  ;;  %v832_v56 = vpop.f32.mrb[30].mxu1  ;;  %v1550_v19 = vsel %vm1548_vm5, %v1516_v21, -1.0  ;;  %v1485_v23 = vadd.f32 %v3541_v58, %v1447_v45 }
 0x1be   : > { %v1309_v17 = vmax.f32 %v1307_v60, %v1308_v14  ;;  %v3580_v52 = vpop.f32.mrb[31].mxu0  ;;  %v3582_v63 = vpop.f32.mrb[31].mxu1  ;;  %v1581_v49 = vmax.f32 %v1515_v48, %v1550_v19  ;;  %v1312_v32 = vmax.f32 %v1310_v37, %v1311_v0  ;;  %v1440_v1 = vsel %vm1412_vm3, %v1383_v61, %v1384_v46 }
 0x1bf   : > { %v1185_v51 = vadd.f32 %v3435_v42, %v689_v18  ;;  %v1448_v60 = vadd.f32 %v1440_v1, %v3458_v8  ;;  %v1385_v62 = vrot.slane %v832_v56, 1  ;;  %v1216_v30 = vmax.f32 %v1184_v16, 0.0 }
 0x1c0   : > { %v2127_v22 = vsel %vm2126_vm6, %v1309_v17, %v2125_v38  ;;  %v1582_v14 = vrot.slane %v1581_v49, 4  ;;  %v1313_v21 = vrot.slane %v1312_v32, 2  ;;  %v1375_v37 = vmax.f32 %v3511_v6, %v1374_v24 }
 0x1c1   : > { %v1217_v10 = vmax.f32 %v1185_v51, 0.0  ;;  %v1486_v48 = vadd.f32 %v3541_v58, %v1448_v60  ;;  %v1439_v61 = vsel %vm1412_vm3, %v1384_v46, %v1385_v62  ;;  %v3597_v17 = vmax.f32 %v1363_v41, %v1364_v15 }
 0x1c2   : > { %v1583_v0 = vmax.f32 %v1581_v49, %v1582_v14  ;;  %v1314_v38 = vmax.f32 %v1312_v32, %v1313_v21  ;;  %v1449_v45 = vadd.f32 %v1439_v61, %v3465_v25  ;;  %v1517_v49 = vmax.f32 %v1485_v23, 0.0 }
 0x1c3   : > { %v1317_v18 = vmax.f32 %v1216_v30, %v1217_v10  ;;  %v695_v8 = vpop.f32.mrb[32].mxu0  ;;  %v838_v56 = vpop.f32.mrb[32].mxu1  ;;  %4533 = vst [vmem:[#allocation30_spill] sm:$0xff] %v3597_v17  ;;  %v1518_v16 = vmax.f32 %v1486_v48, 0.0  ;;  %v1376_v14 = vrot.slane %v1375_v37, 2 }
 0x1c4   : > { %v1186_v2 = vadd.f32 %v3435_v42, %v695_v8  ;;  %v1386_v13 = vrot.slane %v838_v56, 1  ;;  %v3600_v19 = vpop.f32.mrb[33].mxu0  ;;  %v3602_v6 = vpop.f32.mrb[33].mxu1  ;;  %v1315_v46 = vrot.slane %v1314_v38, 1  ;;  %v1584_v25 = vrot.slane %v1583_v0, 2 }
 0x1c5   : > { %v1318_v32 = vrot.slane %v1317_v18, 4  ;;  %v699_v30 = vpop.f32.mrb[34].mxu0  ;;  %v842_v10 = vpop.f32.mrb[34].mxu1  ;;  %v1552_v41 = vsel %vm1548_vm5, %v1518_v16, -1.0 }
 0x1c6   : > { %v1438_v15 = vsel %vm1412_vm3, %v1385_v62, %v1386_v13  ;;  %v1187_v1 = vadd.f32 %v3435_v42, %v699_v30  ;;  %v3610_v51 = vpop.f32.mrb[35].mxu0  ;;  %v3612_v60 = vpop.f32.mrb[35].mxu1  ;;  %v1316_v21 = vmax.f32 %v1314_v38, %v1315_v46  ;;  %v1588_v48 = vmax.f32 %v1517_v49, %v1552_v41  ;;  %v2921_v30 = vld [vmem:[#allocation9 + $0x68] sm:$0xff]  }
 0x1c7   : > { %v1319_v23 = vmax.f32 %v1317_v18, %v1318_v32  ;;  %v1218_v61 = vmax.f32 %v1186_v2, 0.0  ;;  %v1450_v8 = vadd.f32 %v1438_v15, %v3471_v33  ;;  %v1387_v24 = vrot.slane %v842_v10, 1  ;;  %2696 = vmatprep.subr.bf16.mxu1 %v2921_v30  ;;  %v2922_v32 = vld [vmem:[#allocation9 + $0x28] sm:$0xff]   ;;  %v2923_v30 = vld [vmem:[#allocation9 + $0x70] sm:$0xff]  }
 0x1c8   : > { %v1219_v56 = vmax.f32 %v1187_v1, 0.0  ;;  %v2129_v16 = vsel %vm2128_vm7, %v1316_v21, %v2127_v22  ;;  %v1589_v17 = vrot.slane %v1588_v48, 4  ;;  %v1487_v62 = vadd.f32 %v3541_v58, %v1449_v45  ;;  %2697 = vmatpush3.bf16.msra.mxu1 %v2922_v32 }
 0x1c9   : > { %v1320_v57 = vrot.slane %v1319_v23, 2  ;;  %v1585_v34 = vmax.f32 %v1583_v0, %v1584_v25  ;;  %v1488_v26 = vadd.f32 %v3541_v58, %v1450_v8  ;;  %v1437_v38 = vsel %vm1412_vm3, %v1386_v13, %v1387_v24  ;;  %2698 = vmatprep.subr.bf16.mxu1 %v2923_v30 }
 0x1ca   : > { %v1324_v9 = vmax.f32 %v1218_v61, %v1219_v56  ;;  %v3620_v18 = vmax.f32 %v1375_v37, %v1376_v14  ;;  %v1590_v2 = vmax.f32 %v1588_v48, %v1589_v17  ;;  %v1451_v46 = vadd.f32 %v1437_v38, %v3480_v55 }
 0x1cb   : > { %v1321_v33 = vmax.f32 %v1319_v23, %v1320_v57  ;;  %v705_v49 = vpop.f32.mrb[36].mxu0  ;;  %v848_v22 = vpop.f32.mrb[36].mxu1  ;;  %v1520_v10 = vmax.f32 %v1488_v26, 0.0  ;;  %v1519_v37 = vmax.f32 %v1487_v62, 0.0  ;;  %v1586_v55 = vrot.slane %v1585_v34, 1 }
 0x1cc   : > { %v1325_v45 = vrot.slane %v1324_v9, 4  ;;  %v1388_v41 = vrot.slane %v848_v22, 1  ;;  %v3623_v0 = vpop.f32.mrb[37].mxu0  ;;  %v3625_v25 = vpop.f32.mrb[37].mxu1  ;;  %v1591_v15 = vrot.slane %v1590_v2, 2  ;;  %v1188_v17 = vadd.f32 %v3435_v42, %v705_v49 }
 0x1cd   : > { %v1322_v13 = vrot.slane %v1321_v33, 1  ;;  %v709_v57 = vpop.f32.mrb[38].mxu0  ;;  %v852_v1 = vpop.f32.mrb[38].mxu1  ;;  %v1554_v14 = vsel %vm1548_vm5, %v1520_v10, -1.0  ;;  %v1489_v62 = vadd.f32 %v3541_v58, %v1451_v46 }
 0x1ce   : > { %v1326_v26 = vmax.f32 %v1324_v9, %v1325_v45  ;;  %v1436_v21 = vsel %vm1412_vm3, %v1387_v24, %v1388_v41  ;;  %v3632_v48 = vpop.f32.mrb[39].mxu0  ;;  %v3634_v23 = vpop.f32.mrb[39].mxu1  ;;  %v1592_v61 = vmax.f32 %v1590_v2, %v1591_v15  ;;  %v1595_v56 = vmax.f32 %v1519_v37, %v1554_v14  ;;  %v2924_v9 = vld [vmem:[#allocation9 + $0x30] sm:$0xff]  }
 0x1cf   : > { %v1323_v8 = vmax.f32 %v1321_v33, %v1322_v13  ;;  %v1452_v49 = vadd.f32 %v1436_v21, %v3486_v4  ;;  %v1189_v22 = vadd.f32 %v3435_v42, %v709_v57  ;;  %v1389_v32 = vrot.slane %v852_v1, 1  ;;  %2699 = vmatpush3.bf16.msra.mxu1 %v2924_v9 }
 0x1d0   : > { %v1327_v38 = vrot.slane %v1326_v26, 2  ;;  %v1593_v10 = vrot.slane %v1592_v61, 1  ;;  %v1596_v45 = vrot.slane %v1595_v56, 4  ;;  %v1220_v24 = vmax.f32 %v1188_v17, 0.0  ;;  %v2925_v17 = vld [vmem:[#allocation9 + $0x78] sm:$0xff]  }
 0x1d1   : > { %v3640_v3 = vsel %vm2130_vm8, %v1323_v8, %v2129_v16  ;;  %v1490_v33 = vadd.f32 %v3541_v58, %v1452_v49  ;;  %v1221_v15 = vmax.f32 %v1189_v22, 0.0  ;;  %v1435_v46 = vsel %vm1412_vm3, %v1388_v41, %v1389_v32  ;;  %v2926_v49 = vld [vmem:[#allocation9 + $0x38] sm:$0xff]   ;;  %2700 = vmatprep.subr.bf16.mxu1 %v2925_v17 }
 0x1d2   : > { %4534 = vst [vmem:[#allocation31_spill] sm:$0xff] %v3640_v3  ;;  %v1328_v2 = vmax.f32 %v1326_v26, %v1327_v38  ;;  %v1587_v4 = vmax.f32 %v1585_v34, %v1586_v55  ;;  %v1594_v13 = vmax.f32 %v1592_v61, %v1593_v10  ;;  %v1597_v37 = vmax.f32 %v1595_v56, %v1596_v45 }
 0x1d3   : > { %v1453_v57 = vadd.f32 %v1435_v46, %v3495_v28  ;;  %v715_v1 = vpop.f32.mrb[40].mxu0  ;;  %v858_v14 = vpop.f32.mrb[40].mxu1  ;;  %v1378_v21 = vrot.slane %v3620_v18, 1  ;;  %v1521_v16 = vmax.f32 %v1489_v62, 0.0  ;;  %v1522_v8 = vmax.f32 %v1490_v33, 0.0  ;;  %2701 = vmatpush3.bf16.msra.mxu1 %v2926_v49 }
 0x1d4   : > { %v1331_v26 = vmax.f32 %v1220_v24, %v1221_v15  ;;  %v3647_v30 = vpop.f32.mrb[41].mxu0  ;;  %v3649_v38 = vpop.f32.mrb[41].mxu1  ;;  %v1598_v41 = vrot.slane %v1597_v37, 2  ;;  %v1190_v34 = vadd.f32 %v3435_v42, %v715_v1  ;;  %v1390_v55 = vrot.slane %v858_v14, 1 }
 0x1d5   : > { %v719_v61 = vpop.f32.mrb[42].mxu0  ;;  %v862_v56 = vpop.f32.mrb[42].mxu1  ;;  %v3653_v28 = vsel %vm2118_vm0, %v1594_v13, %v1587_v4  ;;  %v4536_v22 = vrot.slane %v3575_v20, 1  ;;  %v1329_v9 = vrot.slane %v1328_v2, 1  ;;  %v1556_v10 = vsel %vm1548_vm5, %v1522_v8, -1.0 }
 0x1d6   : > { %4535 = vst [vmem:[#allocation32_spill] sm:$0xff] %v3653_v28  ;;  %v1332_v45 = vrot.slane %v1331_v26, 4  ;;  %v3662_v24 = vpop.f32.mrb[43].mxu0  ;;  %v3664_v33 = vpop.f32.mrb[43].mxu1  ;;  %v1599_v15 = vmax.f32 %v1597_v37, %v1598_v41  ;;  %v1602_v46 = vmax.f32 %v1521_v16, %v1556_v10  ;;  %v1491_v4 = vadd.f32 %v3541_v58, %v1453_v57 }
 0x1d7   : > { %v3658_v62 = vmax.f32 %v3575_v20, %v4536_v22  ;;  %v1434_v13 = vsel %vm1412_vm3, %v1389_v32, %v1390_v55  ;;  %v1191_v14 = vadd.f32 %v3435_v42, %v719_v61  ;;  %v1391_v17 = vrot.slane %v862_v56, 1 }
 0x1d8   : > { %v1333_v1 = vmax.f32 %v1331_v26, %v1332_v45  ;;  %v1454_v20 = vadd.f32 %v1434_v13, %v3502_v40  ;;  %v3672_v8 = vmax.f32 %v3620_v18, %v1378_v21  ;;  %v1600_v22 = vrot.slane %v1599_v15, 1 }
 0x1d9   : > { %4537 = vst [vmem:[#allocation33_spill] sm:$0xff] %v3658_v62  ;;  %v1603_v3 = vrot.slane %v1602_v46, 4  ;;  %v1222_v37 = vmax.f32 %v1190_v34, 0.0  ;;  %v1223_v49 = vmax.f32 %v1191_v14, 0.0  ;;  %v1433_v32 = vsel %vm1412_vm3, %v1390_v55, %v1391_v17 }
 0x1da   : > { %4538 = vst [vmem:[#allocation34_spill] sm:$0xff] %v3672_v8  ;;  %v1334_v16 = vrot.slane %v1333_v1, 2  ;;  %v1492_v57 = vadd.f32 %v3541_v58, %v1454_v20  ;;  %v1330_v26 = vmax.f32 %v1328_v2, %v1329_v9  ;;  %v1523_v41 = vmax.f32 %v1491_v4, 0.0 }
 0x1db   : > { %v1604_v40 = vmax.f32 %v1602_v46, %v1603_v3  ;;  %v1455_v42 = vadd.f32 %v1433_v32, %v3516_v59  ;;  %v868_v61 = vpop.f32.mrb[44].mxu1  ;;  %v3679_v18 = vpop.f32.mrb[44].mxu0  ;;  %v1338_v10 = vmax.f32 %v1222_v37, %v1223_v49  ;;  %v3685_v20 = vmax.f32 %v1599_v15, %v1600_v22 }
 0x1dc   : > { %4539 = vst [vmem:[#allocation35_spill] sm:$0xff] %v3679_v18  ;;  %v1335_v21 = vmax.f32 %v1333_v1, %v1334_v16  ;;  %v1524_v56 = vmax.f32 %v1492_v57, 0.0  ;;  %v1392_v45 = vrot.slane %v868_v61, 1  ;;  %v3681_v34 = vpop.f32.mrb[45].mxu1  ;;  %v3683_v13 = vpop.f32.mrb[45].mxu0 }
 0x1dd   : > { %4540 = vst [vmem:[#allocation36_spill] sm:$0xff] %v3683_v13  ;;  %4541 = vst [vmem:[#allocation37_spill] sm:$0xff] %v3685_v20  ;;  %v1605_v14 = vrot.slane %v1604_v40, 2  ;;  %v1493_v2 = vadd.f32 %v3541_v58, %v1455_v42  ;;  %v872_v55 = vpop.f32.mrb[46].mxu1  ;;  %v1005_v59 = vpop.f32.mrb[46].mxu0  ;;  %v1339_v4 = vrot.slane %v1338_v10, 4 }
 0x1de   : > { %v1336_v9 = vrot.slane %v1335_v21, 1  ;;  %v1558_v46 = vsel %vm1548_vm5, %v1524_v56, -1.0  ;;  %v1432_v1 = vsel %vm1412_vm3, %v1391_v17, %v1392_v45  ;;  %v3693_v37 = vpop.f32.mrb[47].mxu0  ;;  %v3695_v16 = vpop.f32.mrb[47].mxu1  ;;  %v4510_v49 = vrot.slane %v3683_v13, 2 }
 0x1df   : > { %v1606_v15 = vmax.f32 %v1604_v40, %v1605_v14  ;;  %v1609_v22 = vmax.f32 %v1523_v41, %v1558_v46  ;;  %v1456_v57 = vadd.f32 %v1432_v1, %v3523_v29  ;;  %v1340_v42 = vmax.f32 %v1338_v10, %v1339_v4 }
 0x1e0   : > { %v1337_v32 = vmax.f32 %v1335_v21, %v1336_v9  ;;  %v1393_v61 = vrot.slane %v872_v55, 1  ;;  %v1694_v3 = vrot.slane %v1005_v59, 1  ;;  %v1525_v56 = vmax.f32 %v1493_v2, 0.0 }
 0x1e1   : > { %v1610_v8 = vrot.slane %v1609_v22, 4  ;;  %v1494_v62 = vadd.f32 %v3541_v58, %v1456_v57  ;;  %v1790_v17 = vrot.slane %v3693_v37, 2  ;;  %v1341_v28 = vrot.slane %v1340_v42, 2 }
 0x1e2   : > { %v2132_v20 = vsel %vm2118_vm0, %v1337_v32, %v1330_v26  ;;  %v1431_v40 = vsel %vm1412_vm3, %v1392_v45, %v1393_v61  ;;  %v4542_v29 = vrot.slane %v3679_v18, 1  ;;  %v1607_v21 = vrot.slane %v1606_v15, 1 }
 0x1e3   : > { %v1611_v10 = vmax.f32 %v1609_v22, %v1610_v8  ;;  %v1526_v14 = vmax.f32 %v1494_v62, 0.0  ;;  %v1457_v2 = vadd.f32 %v1431_v40, %v3543_v7  ;;  %v878_v55 = vpop.f32.mrb[48].mxu1  ;;  %v1011_v59 = vpop.f32.mrb[48].mxu0  ;;  %v1342_v9 = vmax.f32 %v1340_v42, %v1341_v28 }
 0x1e4   : > { %v1755_v41 = vsel %vm1412_vm3, %v4542_v29, %v1694_v3  ;;  %v1852_v26 = vsel %vm1821_vm9, %v4510_v49, %v1790_v17  ;;  %v1394_v45 = vrot.slane %v878_v55, 1  ;;  %v3714_v4 = vpop.f32.mrb[49].mxu1  ;;  %v1013_v1 = vpop.f32.mrb[49].mxu0  ;;  %v1695_v8 = vrot.slane %v1011_v59, 1 }
 0x1e5   : > { %v1757_v46 = vadd.f32 %v1755_v41, %v3518_v11  ;;  %v1612_v37 = vrot.slane %v1611_v10, 2  ;;  %v1560_v62 = vsel %vm1548_vm5, %v1526_v14, -1.0  ;;  %v1495_v7 = vadd.f32 %v3541_v58, %v1457_v2  ;;  %v882_v22 = vpop.f32.mrb[50].mxu1  ;;  %v1015_v28 = vpop.f32.mrb[50].mxu0 }
 0x1e6   : > { %v1343_v57 = vrot.slane %v1342_v9, 1  ;;  %v1616_v11 = vmax.f32 %v1525_v56, %v1560_v62  ;;  %v1430_v42 = vsel %vm1412_vm3, %v1393_v61, %v1394_v45  ;;  %v3721_v40 = vpop.f32.mrb[51].mxu0  ;;  %v3723_v29 = vpop.f32.mrb[51].mxu1  ;;  %v3725_v41 = vmax.f32 %v1606_v15, %v1607_v21 }
 0x1e7   : > { %v1854_v32 = vadd.f32 %v1852_v26, %v1757_v46  ;;  %v3727_v55 = vmax.f32 %v1611_v10, %v1612_v37  ;;  %v1458_v14 = vadd.f32 %v1430_v42, %v3551_v36  ;;  %v1754_v2 = vsel %vm1412_vm3, %v1694_v3, %v1695_v8 }
 0x1e8   : > { %v1344_v56 = vmax.f32 %v1342_v9, %v1343_v57  ;;  %v1617_v59 = vrot.slane %v1616_v11, 4  ;;  %v1527_v46 = vmax.f32 %v1495_v7, 0.0  ;;  %v1758_v61 = vadd.f32 %v1754_v2, %v3525_v31 }
 0x1e9   : > { %v1892_v26 = vadd.f32 %v3568_v53, %v1854_v32  ;;  %v1496_v62 = vadd.f32 %v3541_v58, %v1458_v14  ;;  %v1791_v15 = vrot.slane %v1013_v1, 2  ;;  %v1395_v21 = vrot.slane %v882_v22, 1 }
 0x1ea   : > { %v2133_v36 = vsel %vm2120_vm1, %v1344_v56, %v2132_v20  ;;  %v1618_v37 = vmax.f32 %v1616_v11, %v1617_v59  ;;  %v1696_v42 = vrot.slane %v1015_v28, 1  ;;  %v1792_v14 = vrot.slane %v3721_v40, 2 }
 0x1eb   : > { %v2134_v3 = vsel %vm2122_vm2, %v3565_v35, %v2133_v36  ;;  %v1528_v9 = vmax.f32 %v1496_v62, 0.0  ;;  %v1851_v7 = vsel %vm1821_vm9, %v1790_v17, %v1791_v15  ;;  %v1429_v31 = vsel %vm1412_vm3, %v1394_v45, %v1395_v21  ;;  %v888_v57 = vpop.f32.mrb[52].mxu1  ;;  %v3744_v32 = vpop.f32.mrb[52].mxu0 }
 0x1ec   : > { %v3748_v1 = vsel %vm2124_vm4, %v3590_v5, %v2134_v3  ;;  %v1619_v20 = vrot.slane %v1618_v37, 2  ;;  %v1855_v22 = vadd.f32 %v1851_v7, %v1758_v61  ;;  %v1459_v28 = vadd.f32 %v1429_v31, %v3570_v44  ;;  %v3751_v11 = vpop.f32.mrb[53].mxu1  ;;  %v1023_v35 = vpop.f32.mrb[53].mxu0 }
 0x1ed   : > { %4543 = vst [vmem:[#allocation38_spill] sm:$0xff] %v3748_v1  ;;  %v1562_v17 = vsel %vm1548_vm5, %v1528_v9, -1.0  ;;  %v1753_v45 = vsel %vm1412_vm3, %v1695_v8, %v1696_v42  ;;  %v1396_v2 = vrot.slane %v888_v57, 1  ;;  %v892_v56 = vpop.f32.mrb[54].mxu1  ;;  %v3758_v59 = vpop.f32.mrb[54].mxu0  ;;  %v1924_v5 = vmax.f32 %v1892_v26, 0.0 }
 0x1ee   : > { %v1623_v62 = vmax.f32 %v1527_v46, %v1562_v17  ;;  %v1893_v61 = vadd.f32 %v3568_v53, %v1855_v22  ;;  %v1497_v44 = vadd.f32 %v3541_v58, %v1459_v28  ;;  %v3762_v36 = vpop.f32.mrb[55].mxu0  ;;  %v3764_v3 = vpop.f32.mrb[55].mxu1  ;;  %v1759_v9 = vadd.f32 %v1753_v45, %v3545_v12 }
 0x1ef   : > { %v1850_v8 = vsel %vm1821_vm9, %v1791_v15, %v1792_v14  ;;  %v1428_v40 = vsel %vm1412_vm3, %v1395_v21, %v1396_v2  ;;  %v1697_v7 = vrot.slane %v3744_v32, 1  ;;  %v3772_v26 = vmax.f32 %v1618_v37, %v1619_v20 }
 0x1f0   : > { %v1624_v46 = vrot.slane %v1623_v62, 4  ;;  %v1925_v31 = vmax.f32 %v1893_v61, 0.0  ;;  %v1460_v57 = vadd.f32 %v1428_v40, %v3580_v52  ;;  %v1856_v22 = vadd.f32 %v1850_v8, %v1759_v9 }
 0x1f1   : > { %v1752_v28 = vsel %vm1412_vm3, %v1696_v42, %v1697_v7  ;;  %v1793_v17 = vrot.slane %v1023_v35, 2  ;;  %v1397_v12 = vrot.slane %v892_v56, 1  ;;  %v1529_v20 = vmax.f32 %v1497_v44, 0.0 }
 0x1f2   : > { %v3777_v45 = vmax.f32 %v1623_v62, %v1624_v46  ;;  %v1959_v15 = vsel %vm1957_vm10, %v1925_v31, -1.0  ;;  %v1498_v21 = vadd.f32 %v3541_v58, %v1460_v57  ;;  %v1760_v37 = vadd.f32 %v1752_v28, %v3553_v43 }
 0x1f3   : > { %v1990_v32 = vmax.f32 %v1924_v5, %v1959_v15  ;;  %v1849_v52 = vsel %vm1821_vm9, %v1792_v14, %v1793_v17  ;;  %v1427_v61 = vsel %vm1412_vm3, %v1396_v2, %v1397_v12  ;;  %v898_v42 = vpop.f32.mrb[56].mxu1  ;;  %v3787_v35 = vpop.f32.mrb[56].mxu0  ;;  %v1894_v56 = vadd.f32 %v3568_v53, %v1856_v22 }
 0x1f4   : > { %v1530_v62 = vmax.f32 %v1498_v21, 0.0  ;;  %v1857_v9 = vadd.f32 %v1849_v52, %v1760_v37  ;;  %v1461_v8 = vadd.f32 %v1427_v61, %v3600_v19  ;;  %v3791_v40 = vpop.f32.mrb[57].mxu1  ;;  %v1033_v43 = vpop.f32.mrb[57].mxu0  ;;  %v1698_v14 = vrot.slane %v3758_v59, 1 }
 0x1f5   : > { %v1991_v44 = vrot.slane %v1990_v32, 4  ;;  %v1794_v46 = vrot.slane %v3762_v36, 2  ;;  %v3796_v2 = vpop.f32.mrb[58].mxu1  ;;  %v3798_v31 = vpop.f32.mrb[58].mxu0  ;;  %v1398_v28 = vrot.slane %v898_v42, 1  ;;  %v1926_v61 = vmax.f32 %v1894_v56, 0.0 }
 0x1f6   : > { %v1564_v57 = vsel %vm1548_vm5, %v1530_v62, -1.0  ;;  %v1895_v22 = vadd.f32 %v3568_v53, %v1857_v9  ;;  %v1499_v19 = vadd.f32 %v3541_v58, %v1461_v8  ;;  %v3804_v15 = vpop.f32.mrb[59].mxu0  ;;  %v3806_v21 = vpop.f32.mrb[59].mxu1  ;;  %v1751_v36 = vsel %vm1412_vm3, %v1697_v7, %v1698_v14 }
 0x1f7   : > { %v1992_v37 = vmax.f32 %v1990_v32, %v1991_v44  ;;  %v3808_v59 = vmax.f32 %v1529_v20, %v1564_v57  ;;  %v1848_v52 = vsel %vm1821_vm9, %v1793_v17, %v1794_v46  ;;  %v1761_v9 = vadd.f32 %v1751_v36, %v3572_v27 }
 0x1f8   : > { %v1927_v62 = vmax.f32 %v1895_v22, 0.0  ;;  %v1426_v42 = vsel %vm1412_vm3, %v1397_v12, %v1398_v28  ;;  %v1531_v49 = vmax.f32 %v1499_v19, 0.0  ;;  %v1699_v32 = vrot.slane %v3787_v35, 1 }
 0x1f9   : > { %v1993_v8 = vrot.slane %v1992_v37, 2  ;;  %v1462_v5 = vadd.f32 %v1426_v42, %v3610_v51  ;;  %v1858_v7 = vadd.f32 %v1848_v52, %v1761_v9  ;;  %v1795_v44 = vrot.slane %v1033_v43, 2 }
 0x1fa   : > { %v1961_v20 = vsel %vm1957_vm10, %v1927_v62, -1.0  ;;  %v1399_v17 = vrot.slane %v3796_v2, 1  ;;  %v1750_v12 = vsel %vm1412_vm3, %v1698_v14, %v1699_v32 }
 0x1fb   : > { %v1994_v56 = vmax.f32 %v1992_v37, %v1993_v8  ;;  %v1997_v57 = vmax.f32 %v1926_v61, %v1961_v20  ;;  %v1500_v27 = vadd.f32 %v3541_v58, %v1462_v5  ;;  %v908_v22 = vpop.f32.mrb[60].mxu1  ;;  %v3825_v19 = vpop.f32.mrb[60].mxu0  ;;  %v1896_v51 = vadd.f32 %v3568_v53, %v1858_v7 }
 0x1fc   : > { %v1762_v35 = vadd.f32 %v1750_v12, %v3582_v63  ;;  %v1847_v36 = vsel %vm1821_vm9, %v1794_v46, %v1795_v44  ;;  %v1425_v43 = vsel %vm1412_vm3, %v1398_v28, %v1399_v17  ;;  %v3833_v2 = vpop.f32.mrb[61].mxu1  ;;  %v3835_v37 = vpop.f32.mrb[61].mxu0  ;;  %v1700_v46 = vrot.slane %v3798_v31, 1 }
 0x1fd   : > { %v1995_v5 = vrot.slane %v1994_v56, 1  ;;  %v1998_v52 = vrot.slane %v1997_v57, 4  ;;  %v1532_v14 = vmax.f32 %v1500_v27, 0.0  ;;  %v1463_v61 = vadd.f32 %v1425_v43, %v3623_v0  ;;  %v3838_v62 = vpop.f32.mrb[62].mxu1  ;;  %v3840_v9 = vpop.f32.mrb[62].mxu0 }
 0x1fe   : > { %v1859_v42 = vadd.f32 %v1847_v36, %v1762_v35  ;;  %v1796_v28 = vrot.slane %v3804_v15, 2  ;;  %v3845_v8 = vpop.f32.mrb[63].mxu0  ;;  %v3847_v20 = vpop.f32.mrb[63].mxu1  ;;  %v1928_v12 = vmax.f32 %v1896_v51, 0.0  ;;  %v1749_v35 = vsel %vm1412_vm3, %v1699_v32, %v1700_v46 }
 0x1ff   : > { %v3849_v7 = vmax.f32 %v1994_v56, %v1995_v5  ;;  %v1999_v27 = vmax.f32 %v1997_v57, %v1998_v52  ;;  %v1566_v0 = vsel %vm1548_vm5, %v1532_v14, -1.0  ;;  %v1501_v36 = vadd.f32 %v3541_v58, %v1463_v61 }
 0x200   : > { %v1637_v43 = vmax.f32 %v1531_v49, %v1566_v0  ;;  %v1897_v10 = vadd.f32 %v3568_v53, %v1859_v42  ;;  %v1846_v31 = vsel %vm1821_vm9, %v1795_v44, %v1796_v28  ;;  %v1763_v56 = vadd.f32 %v1749_v35, %v3602_v6 }
 0x201   : > { %4544 = vst [vmem:[#allocation39_spill] sm:$0xff] %v3849_v7  ;;  %v2000_v15 = vrot.slane %v1999_v27, 2  ;;  %v1400_v5 = vrot.slane %v908_v22, 1  ;;  %v1701_v52 = vrot.slane %v3825_v19, 1  ;;  %v1797_v49 = vrot.slane %v3835_v37, 2 }
 0x202   : > { %v1638_v57 = vrot.slane %v1637_v43, 4  ;;  %v1929_v51 = vmax.f32 %v1897_v10, 0.0  ;;  %v1860_v42 = vadd.f32 %v1846_v31, %v1763_v56  ;;  %v1401_v0 = vrot.slane %v3838_v62, 1 }
 0x203   : > { %v2001_v14 = vmax.f32 %v1999_v27, %v2000_v15  ;;  %v1424_v32 = vsel %vm1412_vm3, %v1399_v17, %v1400_v5  ;;  %v3865_v44 = vpop.f32.mrb[64].mxu1  ;;  %v3867_v63 = vpop.f32.mrb[64].mxu0  ;;  %v1748_v22 = vsel %vm1412_vm3, %v1700_v46, %v1701_v52  ;;  %v1533_v62 = vmax.f32 %v1501_v36, 0.0 }
 0x204   : > { %v1639_v61 = vmax.f32 %v1637_v43, %v1638_v57  ;;  %v1963_v6 = vsel %vm1957_vm10, %v1929_v51, -1.0  ;;  %v1464_v10 = vadd.f32 %v1424_v32, %v3632_v48  ;;  %v3874_v19 = vpop.f32.mrb[65].mxu1  ;;  %v3876_v37 = vpop.f32.mrb[65].mxu0  ;;  %v1764_v35 = vadd.f32 %v1748_v22, %v3612_v60 }
 0x205   : > { %v2002_v17 = vrot.slane %v2001_v14, 1  ;;  %v2004_v27 = vmax.f32 %v1928_v12, %v1963_v6  ;;  %v3879_v31 = vpop.f32.mrb[66].mxu1  ;;  %v3881_v43 = vpop.f32.mrb[66].mxu0  ;;  %v1845_v48 = vsel %vm1821_vm9, %v1796_v28, %v1797_v49  ;;  %v1423_v46 = vsel %vm1412_vm3, %v1400_v5, %v1401_v0 }
 0x206   : > { %v1640_v15 = vrot.slane %v1639_v61, 2  ;;  %v1502_v56 = vadd.f32 %v3541_v58, %v1464_v10  ;;  %v3888_v57 = vpop.f32.mrb[67].mxu0  ;;  %v3890_v51 = vpop.f32.mrb[67].mxu1  ;;  %v1898_v36 = vadd.f32 %v3568_v53, %v1860_v42  ;;  %v1861_v32 = vadd.f32 %v1845_v48, %v1764_v35 }
 0x207   : > { %v3892_v12 = vmax.f32 %v2001_v14, %v2002_v17  ;;  %v2005_v60 = vrot.slane %v2004_v27, 4  ;;  %v1465_v10 = vadd.f32 %v1423_v46, %v3647_v30  ;;  %v1702_v7 = vrot.slane %v3840_v9, 1 }
 0x208   : > { %v1641_v6 = vmax.f32 %v1639_v61, %v1640_v15  ;;  %v1534_v22 = vmax.f32 %v1502_v56, 0.0  ;;  %v1899_v13 = vadd.f32 %v3568_v53, %v1861_v32  ;;  %v1798_v5 = vrot.slane %v3845_v8, 2 }
 0x209   : > { %4545 = vst [vmem:[#allocation40_spill] sm:$0xff] %v3892_v12  ;;  %v2006_v28 = vmax.f32 %v2004_v27, %v2005_v60  ;;  %v1402_v18 = vrot.slane %v3865_v44, 1  ;;  %v1503_v42 = vadd.f32 %v3541_v58, %v1465_v10  ;;  %v1747_v61 = vsel %vm1412_vm3, %v1701_v52, %v1702_v7 }
 0x20a   : > { %v1642_v1 = vrot.slane %v1641_v6, 1  ;;  %v1568_v14 = vsel %vm1548_vm5, %v1534_v22, -1.0  ;;  %v1931_v35 = vmax.f32 %v1899_v13, 0.0  ;;  %v1765_v9 = vadd.f32 %v1747_v61, %v3625_v25 }
 0x20b   : > { %v2007_v17 = vrot.slane %v2006_v28, 2  ;;  %v1644_v30 = vmax.f32 %v1533_v62, %v1568_v14  ;;  %v3906_v27 = vpop.f32.mrb[68].mxu1  ;;  %v3908_v15 = vpop.f32.mrb[68].mxu0  ;;  %v1930_v44 = vmax.f32 %v1898_v36, 0.0  ;;  %v1844_v56 = vsel %vm1821_vm9, %v1797_v49, %v1798_v5 }
 0x20c   : > { %v3910_v8 = vmax.f32 %v1641_v6, %v1642_v1  ;;  %v1422_v48 = vsel %vm1412_vm3, %v1401_v0, %v1402_v18  ;;  %v3916_v46 = vpop.f32.mrb[69].mxu1  ;;  %v3918_v52 = vpop.f32.mrb[69].mxu0  ;;  %v1965_v25 = vsel %vm1957_vm10, %v1931_v35, -1.0  ;;  %v1862_v60 = vadd.f32 %v1844_v56, %v1765_v9 }
 0x20d   : > { %v2008_v13 = vmax.f32 %v2006_v28, %v2007_v17  ;;  %v1645_v62 = vrot.slane %v1644_v30, 4  ;;  %v3922_v32 = vpop.f32.mrb[70].mxu1  ;;  %v3924_v1 = vpop.f32.mrb[70].mxu0  ;;  %v2011_v36 = vmax.f32 %v1930_v44, %v1965_v25  ;;  %v1466_v49 = vadd.f32 %v1422_v48, %v3662_v24 }
 0x20e   : > { %v1703_v6 = vrot.slane %v3867_v63, 1  ;;  %v1799_v0 = vrot.slane %v3876_v37, 2  ;;  %v3929_v22 = vpop.f32.mrb[71].mxu0  ;;  %v3931_v10 = vpop.f32.mrb[71].mxu1  ;;  %v1535_v61 = vmax.f32 %v1503_v42, 0.0  ;;  %v1403_v17 = vrot.slane %v3879_v31, 1 }
 0x20f   : > { %v2009_v28 = vrot.slane %v2008_v13, 1  ;;  %v1646_v14 = vmax.f32 %v1644_v30, %v1645_v62  ;;  %v2012_v35 = vrot.slane %v2011_v36, 4  ;;  %v1504_v9 = vadd.f32 %v3541_v58, %v1466_v49 }
 0x210   : > { %v1746_v44 = vsel %vm1412_vm3, %v1702_v7, %v1703_v6  ;;  %v1843_v24 = vsel %vm1821_vm9, %v1798_v5, %v1799_v0  ;;  %v1900_v56 = vadd.f32 %v3568_v53, %v1862_v60  ;;  %v1421_v31 = vsel %vm1412_vm3, %v1402_v18, %v1403_v17 }
 0x211   : > { %v3939_v63 = vmax.f32 %v2008_v13, %v2009_v28  ;;  %v1647_v37 = vrot.slane %v1646_v14, 2  ;;  %v1766_v48 = vadd.f32 %v1746_v44, %v3634_v23  ;;  %v2013_v30 = vmax.f32 %v2011_v36, %v2012_v35 }
 0x212   : > { %v1536_v42 = vmax.f32 %v1504_v9, 0.0  ;;  %v1704_v62 = vrot.slane %v3881_v43, 1  ;;  %v1467_v7 = vadd.f32 %v1421_v31, %v3441_v47  ;;  %v1800_v5 = vrot.slane %v3888_v57, 2 }
 0x213   : > { %4546 = vst [vmem:[#allocation41_spill] sm:$0xff] %v3939_v63  ;;  %v1648_v25 = vmax.f32 %v1646_v14, %v1647_v37  ;;  %v1863_v49 = vadd.f32 %v1843_v24, %v1766_v48  ;;  %v3948_v13 = vpop.f32.mrb[72].mxu1  ;;  %v3950_v28 = vpop.f32.mrb[72].mxu0  ;;  %v2014_v60 = vrot.slane %v2013_v30, 2  ;;  %v1404_v18 = vrot.slane %v3906_v27, 1 }
 0x214   : > { %v1570_v23 = vsel %vm1548_vm5, %v1536_v42, -1.0  ;;  %v1745_v36 = vsel %vm1412_vm3, %v1703_v6, %v1704_v62  ;;  %v3957_v43 = vpop.f32.mrb[73].mxu1  ;;  %v3959_v14 = vpop.f32.mrb[73].mxu0  ;;  %v1505_v9 = vadd.f32 %v3541_v58, %v1467_v7  ;;  %v1842_v27 = vsel %vm1821_vm9, %v1799_v0, %v1800_v5 }
 0x215   : > { %v1649_v47 = vrot.slane %v1648_v25, 1  ;;  %v1651_v35 = vmax.f32 %v1535_v61, %v1570_v23  ;;  %v1901_v57 = vadd.f32 %v3568_v53, %v1863_v49  ;;  %v3963_v44 = vpop.f32.mrb[74].mxu1  ;;  %v3965_v24 = vpop.f32.mrb[74].mxu0  ;;  %v2015_v37 = vmax.f32 %v2013_v30, %v2014_v60 }
 0x216   : > { %v1767_v48 = vadd.f32 %v1745_v36, %v3649_v38  ;;  %v1420_v6 = vsel %vm1412_vm3, %v1403_v17, %v1404_v18  ;;  %v3972_v42 = vpop.f32.mrb[75].mxu0  ;;  %v3974_v61 = vpop.f32.mrb[75].mxu1  ;;  %v1932_v49 = vmax.f32 %v1900_v56, 0.0  ;;  %v1705_v38 = vrot.slane %v3908_v15, 1 }
 0x217   : > { %4547 = vst [vmem:[#allocation42_spill] sm:$0xff] %v3974_v61  ;;  %v3976_v31 = vmax.f32 %v1648_v25, %v1649_v47  ;;  %v1652_v7 = vrot.slane %v1651_v35, 4  ;;  %v1933_v23 = vmax.f32 %v1901_v57, 0.0  ;;  %v2016_v63 = vrot.slane %v2015_v37, 1 }
 0x218   : > { %v1864_v12 = vadd.f32 %v1842_v27, %v1767_v48  ;;  %v1468_v30 = vadd.f32 %v1420_v6, %v3447_v54  ;;  %v1801_v17 = vrot.slane %v3918_v52, 2  ;;  %v1405_v36 = vrot.slane %v3922_v32, 1 }
 0x219   : > { %v1653_v60 = vmax.f32 %v1651_v35, %v1652_v7  ;;  %v1967_v0 = vsel %vm1957_vm10, %v1933_v23, -1.0  ;;  %v3984_v61 = vmax.f32 %v2015_v37, %v2016_v63  ;;  %v1537_v56 = vmax.f32 %v1505_v9, 0.0 }
 0x21a   : > { %v2018_v25 = vmax.f32 %v1932_v49, %v1967_v0  ;;  %v1506_v47 = vadd.f32 %v3541_v58, %v1468_v30  ;;  %v1744_v54 = vsel %vm1412_vm3, %v1704_v62, %v1705_v38  ;;  %v1841_v15 = vsel %vm1821_vm9, %v1800_v5, %v1801_v17  ;;  %v4550_v49 = vld [vmem:[#allocation21_spill] sm:$0xff] }
 0x21b   : > { %4548 = vst [vmem:[#allocation43_spill] sm:$0xff] %v3984_v61  ;;  %v1654_v57 = vrot.slane %v1653_v60, 2  ;;  %v1419_v35 = vsel %vm1412_vm3, %v1404_v18, %v1405_v36  ;;  %v3993_v48 = vpop.f32.mrb[76].mxu1  ;;  %v3995_v52 = vpop.f32.mrb[76].mxu0  ;;  %v1902_v63 = vadd.f32 %v3568_v53, %v1864_v12  ;;  %v1768_v37 = vadd.f32 %v1744_v54, %v3664_v33 }
 0x21c   : > { %v2019_v32 = vrot.slane %v2018_v25, 4  ;;  %v1538_v9 = vmax.f32 %v1506_v47, 0.0  ;;  %v3999_v27 = vpop.f32.mrb[77].mxu1  ;;  %v4001_v6 = vpop.f32.mrb[77].mxu0  ;;  %v1469_v5 = vadd.f32 %v1419_v35, %v4550_v49  ;;  %v1706_v7 = vrot.slane %v3924_v1, 1 }
 0x21d   : > { %4549 = vst [vmem:[#allocation44_spill] sm:$0xff] %v3999_v27  ;;  %v1655_v62 = vmax.f32 %v1653_v60, %v1654_v57  ;;  %v1802_v18 = vrot.slane %v3929_v22, 2  ;;  %v4006_v23 = vpop.f32.mrb[78].mxu1  ;;  %v4008_v30 = vpop.f32.mrb[78].mxu0  ;;  %v1865_v33 = vadd.f32 %v1841_v15, %v1768_v37  ;;  %v1406_v47 = vrot.slane %v3948_v13, 1 }
 0x21e   : > { %v2020_v0 = vmax.f32 %v2018_v25, %v2019_v32  ;;  %v1572_v12 = vsel %vm1548_vm5, %v1538_v9, -1.0  ;;  %v4013_v54 = vpop.f32.mrb[79].mxu0  ;;  %v4015_v60 = vpop.f32.mrb[79].mxu1  ;;  %v1507_v1 = vadd.f32 %v3541_v58, %v1469_v5  ;;  %v1743_v22 = vsel %vm1412_vm3, %v1705_v38, %v1706_v7 }
 0x21f   : > { %4551 = vst [vmem:[#allocation21_spill] sm:$0xff] %v4015_v60  ;;  %v1656_v57 = vrot.slane %v1655_v62, 1  ;;  %v1658_v35 = vmax.f32 %v1537_v56, %v1572_v12  ;;  %v1903_v25 = vadd.f32 %v3568_v53, %v1865_v33  ;;  %v1769_v32 = vadd.f32 %v1743_v22, %v3681_v34  ;;  %v4552_v60 = vld [vmem:[#allocation22_spill] sm:$0xff] }
 0x220   : > { %v2021_v49 = vrot.slane %v2020_v0, 2  ;;  %v1840_v15 = vsel %vm1821_vm9, %v1801_v17, %v1802_v18  ;;  %v1934_v9 = vmax.f32 %v1902_v63, 0.0  ;;  %v1418_v56 = vsel %vm1412_vm3, %v1405_v36, %v1406_v47 }
 0x221   : > { %v4024_v13 = vmax.f32 %v1655_v62, %v1656_v57  ;;  %v1659_v37 = vrot.slane %v1658_v35, 4  ;;  %v1935_v5 = vmax.f32 %v1903_v25, 0.0  ;;  %v1866_v61 = vadd.f32 %v1840_v15, %v1769_v32 }
 0x222   : > { %v2022_v12 = vmax.f32 %v2020_v0, %v2021_v49  ;;  %v1470_v38 = vadd.f32 %v1418_v56, %v4552_v60  ;;  %v1707_v33 = vrot.slane %v3950_v28, 1  ;;  %v1803_v34 = vrot.slane %v3959_v14, 2 }
 0x223   : > { %v1660_v27 = vmax.f32 %v1658_v35, %v1659_v37  ;;  %v1407_v22 = vrot.slane %v3963_v44, 1  ;;  %v4032_v17 = vpop.f32.mrb[80].mxu1  ;;  %v4034_v62 = vpop.f32.mrb[80].mxu0  ;;  %v1969_v36 = vsel %vm1957_vm10, %v1935_v5, -1.0  ;;  %v1539_v0 = vmax.f32 %v1507_v1, 0.0 }
 0x224   : > { %v2023_v63 = vrot.slane %v2022_v12, 1  ;;  %v1508_v57 = vadd.f32 %v3541_v58, %v1470_v38  ;;  %v4039_v49 = vpop.f32.mrb[81].mxu1  ;;  %v4041_v60 = vpop.f32.mrb[81].mxu0  ;;  %v2025_v35 = vmax.f32 %v1934_v9, %v1969_v36  ;;  %v1742_v14 = vsel %vm1412_vm3, %v1706_v7, %v1707_v33 }
 0x225   : > { %4553 = vst [vmem:[#allocation22_spill] sm:$0xff] %v4039_v49  ;;  %v1661_v28 = vrot.slane %v1660_v27, 2  ;;  %v1839_v44 = vsel %vm1821_vm9, %v1802_v18, %v1803_v34  ;;  %v4047_v25 = vpop.f32.mrb[82].mxu1  ;;  %v4049_v32 = vpop.f32.mrb[82].mxu0  ;;  %v1904_v1 = vadd.f32 %v3568_v53, %v1866_v61  ;;  %v1770_v56 = vadd.f32 %v1742_v14, %v3695_v16 }
 0x226   : > { %v4051_v15 = vmax.f32 %v2022_v12, %v2023_v63  ;;  %v1540_v37 = vmax.f32 %v1508_v57, 0.0  ;;  %v4055_v5 = vpop.f32.mrb[83].mxu0  ;;  %v4057_v9 = vpop.f32.mrb[83].mxu1  ;;  %v2026_v7 = vrot.slane %v2025_v35, 4  ;;  %v1417_v18 = vsel %vm1412_vm3, %v1406_v47, %v1407_v22 }
 0x227   : > { %v1662_v38 = vmax.f32 %v1660_v27, %v1661_v28  ;;  %v1708_v36 = vrot.slane %v3965_v24, 1  ;;  %v1867_v63 = vadd.f32 %v1839_v44, %v1770_v56  ;;  %v1804_v57 = vrot.slane %v3972_v42, 2 }
 0x228   : > { %4554 = vst [vmem:[#allocation45_spill] sm:$0xff] %v4051_v15  ;;  %v1574_v12 = vsel %vm1548_vm5, %v1540_v37, -1.0  ;;  %v4555_v15 = vld [vmem:[#allocation23_spill] sm:$0xff]  ;;  %v2027_v14 = vmax.f32 %v2025_v35, %v2026_v7  ;;  %v1936_v56 = vmax.f32 %v1904_v1, 0.0  ;;  %v1408_v42 = vrot.slane %v3993_v48, 1 }
 0x229   : > { %v1471_v61 = vadd.f32 %v1417_v18, %v4555_v15  ;;  %v1663_v16 = vrot.slane %v1662_v38, 1  ;;  %v1665_v49 = vmax.f32 %v1539_v0, %v1574_v12  ;;  %v1741_v27 = vsel %vm1412_vm3, %v1707_v33, %v1708_v36 }
 0x22a   : > { %v1905_v28 = vadd.f32 %v3568_v53, %v1867_v63  ;;  %v1771_v24 = vadd.f32 %v1741_v27, %v3714_v4  ;;  %v1838_v37 = vsel %vm1821_vm9, %v1803_v34, %v1804_v57  ;;  %v2028_v44 = vrot.slane %v2027_v14, 2 }
 0x22b   : > { %v1509_v47 = vadd.f32 %v3541_v58, %v1471_v61  ;;  %v1666_v15 = vrot.slane %v1665_v49, 4  ;;  %v4074_v18 = vpop.f32.mrb[84].mxu0  ;;  %v4076_v0 = vmax.f32 %v1662_v38, %v1663_v16  ;;  %v1709_v7 = vrot.slane %v3995_v52, 1  ;;  %v4556_v16 = vld [vmem:[#allocation24_spill] sm:$0xff] }
 0x22c   : > { %v1937_v35 = vmax.f32 %v1905_v28, 0.0  ;;  %v1868_v33 = vadd.f32 %v1838_v37, %v1771_v24  ;;  %v4079_v12 = vpop.f32.mrb[85].mxu0  ;;  %v4081_v63 = vmax.f32 %v2027_v14, %v2028_v44  ;;  %v1416_v34 = vsel %vm1412_vm3, %v1407_v22, %v1408_v42 }
 0x22d   : > { %v1667_v4 = vmax.f32 %v1665_v49, %v1666_v15  ;;  %v1805_v1 = vrot.slane %v4001_v6, 2  ;;  %v4086_v61 = vpop.f32.mrb[86].mxu0  ;;  %v1541_v38 = vmax.f32 %v1509_v47, 0.0  ;;  %v1472_v27 = vadd.f32 %v1416_v34, %v4556_v16 }
 0x22e   : > { %v1971_v48 = vsel %vm1957_vm10, %v1937_v35, -1.0  ;;  %v1740_v52 = vsel %vm1412_vm3, %v1708_v36, %v1709_v7  ;;  %v4093_v28 = vpop.f32.mrb[87].mxu0  ;;  %v1906_v24 = vadd.f32 %v3568_v53, %v1868_v33  ;;  %v1409_v44 = vrot.slane %v4006_v23, 1 }
 0x22f   : > { %v1668_v14 = vrot.slane %v1667_v4, 2  ;;  %v2032_v49 = vmax.f32 %v1936_v56, %v1971_v48  ;;  %v1772_v22 = vadd.f32 %v1740_v52, %v3723_v29  ;;  %v1510_v37 = vadd.f32 %v3541_v58, %v1472_v27  ;;  %v4557_v52 = vld [vmem:[#allocation25_spill] sm:$0xff] }
 0x230   : > { %v1837_v47 = vsel %vm1821_vm9, %v1804_v57, %v1805_v1  ;;  %v1710_v34 = vrot.slane %v4008_v30, 1  ;;  %v1415_v33 = vsel %vm1412_vm3, %v1408_v42, %v1409_v44  ;;  %v1806_v29 = vrot.slane %v4013_v54, 2 }
 0x231   : > { %v4102_v15 = vmax.f32 %v1667_v4, %v1668_v14  ;;  %v2033_v36 = vrot.slane %v2032_v49, 4  ;;  %v1869_v35 = vadd.f32 %v1837_v47, %v1772_v22  ;;  %v1542_v56 = vmax.f32 %v1510_v37, 0.0 }
 0x232   : > { %v1410_v48 = vrot.slane %v4032_v17, 1  ;;  %v1938_v27 = vmax.f32 %v1906_v24, 0.0  ;;  %v1473_v23 = vadd.f32 %v1415_v33, %v4557_v52  ;;  %v1739_v30 = vsel %vm1412_vm3, %v1709_v7, %v1710_v34 }
 0x233   : > { %v2034_v16 = vmax.f32 %v2032_v49, %v2033_v36  ;;  %v1907_v57 = vadd.f32 %v3568_v53, %v1869_v35  ;;  %v4111_v4 = vpop.f32.mrb[88].mxu0  ;;  %v1576_v14 = vsel %vm1548_vm5, %v1542_v56, -1.0  ;;  %v1836_v42 = vsel %vm1821_vm9, %v1805_v1, %v1806_v29  ;;  %v4558_v35 = vld [vmem:[#allocation26_spill] sm:$0xff] }
 0x234   : > { %v1414_v54 = vsel %vm1412_vm3, %v1409_v44, %v1410_v48  ;;  %v4121_v17 = vpop.f32.mrb[89].mxu0  ;;  %v1672_v24 = vmax.f32 %v1541_v38, %v1576_v14  ;;  %v1511_v37 = vadd.f32 %v3541_v58, %v1473_v23  ;;  %v1773_v36 = vadd.f32 %v1739_v30, %v3751_v11 }
 0x235   : > { %v1939_v22 = vmax.f32 %v1907_v57, 0.0  ;;  %v4125_v47 = vpop.f32.mrb[90].mxu0  ;;  %v1474_v7 = vadd.f32 %v1414_v54, %v4558_v35  ;;  %v1711_v56 = vrot.slane %v4034_v62, 1  ;;  %v1807_v1 = vrot.slane %v4041_v60, 2 }
 0x236   : > { %v4131_v33 = vpop.f32.mrb[91].mxu0  ;;  %v2035_v44 = vrot.slane %v2034_v16, 2  ;;  %v1673_v52 = vrot.slane %v1672_v24, 4  ;;  %v1543_v57 = vmax.f32 %v1511_v37, 0.0  ;;  %v1870_v23 = vadd.f32 %v1836_v42, %v1773_v36 }
 0x237   : > { %v1973_v38 = vsel %vm1957_vm10, %v1939_v22, -1.0  ;;  %v1512_v6 = vadd.f32 %v3541_v58, %v1474_v7  ;;  %v1738_v11 = vsel %vm1412_vm3, %v1710_v34, %v1711_v56  ;;  %v1835_v60 = vsel %vm1821_vm9, %v1806_v29, %v1807_v1  ;;  %v4559_v34 = vld [vmem:[#allocation29_spill] sm:$0xff] }
 0x238   : > { %v2039_v14 = vmax.f32 %v1938_v27, %v1973_v38  ;;  %v1674_v30 = vmax.f32 %v1672_v24, %v1673_v52  ;;  %v1774_v62 = vadd.f32 %v1738_v11, %v3764_v3  ;;  %v1411_v54 = vrot.slane %v4047_v25, 1 }
 0x239   : > { %v1908_v49 = vadd.f32 %v3568_v53, %v1870_v23  ;;  %v1544_v22 = vmax.f32 %v1512_v6, 0.0  ;;  %v1712_v27 = vrot.slane %v4049_v32, 1  ;;  %v4560_v24 = vrot.slane %v4559_v34, 1  ;;  %v4561_v32 = vld [vmem:[#allocation27_spill] sm:$0xff] }
 0x23a   : > { %v2040_v35 = vrot.slane %v2039_v14, 4  ;;  %v1675_v42 = vrot.slane %v1674_v30, 2  ;;  %v1871_v37 = vadd.f32 %v1835_v60, %v1774_v62  ;;  %v1413_v36 = vsel %vm1412_vm3, %v1410_v48, %v1411_v54  ;;  %v4562_v62 = vld [vmem:[#allocation28_spill] sm:$0xff] }
 0x23b   : > { %v1444_v3 = vsel %vm1412_vm3, %v1411_v54, %v4560_v24  ;;  %v4150_v7 = vpop.f32.mrb[92].mxu0  ;;  %v4152_v29 = vmax.f32 %v2034_v16, %v2035_v44  ;;  %v1578_v6 = vsel %vm1548_vm5, %v1544_v22, -1.0  ;;  %v1475_v52 = vadd.f32 %v1413_v36, %v4561_v32 }
 0x23c   : > { %v4154_v25 = vmax.f32 %v2039_v14, %v2040_v35  ;;  %v4159_v38 = vpop.f32.mrb[93].mxu0  ;;  %v1940_v23 = vmax.f32 %v1908_v49, 0.0  ;;  %v1679_v48 = vmax.f32 %v1543_v57, %v1578_v6  ;;  %v1909_v11 = vadd.f32 %v3568_v53, %v1871_v37 }
 0x23d   : > { %v1476_v60 = vadd.f32 %v1444_v3, %v4562_v62  ;;  %v4163_v54 = vpop.f32.mrb[94].mxu0  ;;  %v4165_v34 = vmax.f32 %v1674_v30, %v1675_v42  ;;  %v1513_v16 = vadd.f32 %v3541_v58, %v1475_v52  ;;  %v1737_v44 = vsel %vm1412_vm3, %v1711_v56, %v1712_v27 }
 0x23e   : > { %v1808_v14 = vrot.slane %v4055_v5, 2  ;;  %v4171_v35 = vpop.f32.mrb[95].mxu0  ;;  %v1680_v22 = vrot.slane %v1679_v48, 4  ;;  %v1941_v49 = vmax.f32 %v1909_v11, 0.0  ;;  %v1775_v37 = vadd.f32 %v1737_v44, %v3791_v40 }
 0x23f   : > { %v1514_v57 = vadd.f32 %v3541_v58, %v1476_v60  ;;  %v1545_v36 = vmax.f32 %v1513_v16, 0.0  ;;  %v1713_v42 = vrot.slane %v4074_v18, 1  ;;  %v1809_v24 = vrot.slane %v4079_v12, 2 }
 0x240   : > { %v1834_v30 = vsel %vm1821_vm9, %v1807_v1, %v1808_v14  ;;  %v4179_v3 = vmax.f32 %v1679_v48, %v1680_v22  ;;  %v1975_v5 = vsel %vm1957_vm10, %v1941_v49, -1.0  ;;  %v1714_v1 = vrot.slane %v4086_v61, 1 }
 0x241   : > { %v1546_v56 = vmax.f32 %v1514_v57, 0.0  ;;  %v1872_v6 = vadd.f32 %v1834_v30, %v1775_v37  ;;  %v2046_v32 = vmax.f32 %v1940_v23, %v1975_v5  ;;  %v1736_v58 = vsel %vm1412_vm3, %v1712_v27, %v1713_v42 }
 0x242   : > { %v1833_v40 = vsel %vm1821_vm9, %v1808_v14, %v1809_v24  ;;  %v2042_v18 = vrot.slane %v4154_v25, 2  ;;  %v1776_v48 = vadd.f32 %v1736_v58, %v3806_v21  ;;  %v1735_v27 = vsel %vm1412_vm3, %v1713_v42, %v1714_v1 }
 0x243   : > { %v1580_v12 = vsel %vm1548_vm5, %v1546_v56, -1.0  ;;  %v1910_v52 = vadd.f32 %v3568_v53, %v1872_v6  ;;  %v4193_v11 = vpop.f32.mrb[96].mxu0  ;;  %v2047_v23 = vrot.slane %v2046_v32, 4  ;;  %v1810_v60 = vrot.slane %v4093_v28, 2 }
 0x244   : > { %v1686_v62 = vmax.f32 %v1545_v36, %v1580_v12  ;;  %v4198_v16 = vpop.f32.mrb[97].mxu0  ;;  %v1682_v61 = vrot.slane %v4179_v3, 2  ;;  %v1873_v44 = vadd.f32 %v1833_v40, %v1776_v48  ;;  %v1777_v14 = vadd.f32 %v1735_v27, %v3833_v2 }
 0x245   : > { %v1715_v22 = vrot.slane %v4111_v4, 1  ;;  %v4203_v49 = vpop.f32.mrb[98].mxu0  ;;  %v2048_v21 = vmax.f32 %v2046_v32, %v2047_v23  ;;  %v1832_v37 = vsel %vm1821_vm9, %v1809_v24, %v1810_v60  ;;  %v1811_v36 = vrot.slane %v4121_v17, 2 }
 0x246   : > { %v1687_v57 = vrot.slane %v1686_v62, 4  ;;  %v4208_v30 = vpop.f32.mrb[99].mxu0  ;;  %v1911_v28 = vadd.f32 %v3568_v53, %v1873_v44  ;;  %v1874_v42 = vadd.f32 %v1832_v37, %v1777_v14  ;;  %v1716_v2 = vrot.slane %v4125_v47, 1 }
 0x247   : > { %v1734_v5 = vsel %vm1412_vm3, %v1714_v1, %v1715_v22  ;;  %v2049_v4 = vrot.slane %v2048_v21, 2  ;;  %v1942_v56 = vmax.f32 %v1910_v52, 0.0  ;;  %v1831_v32 = vsel %vm1821_vm9, %v1810_v60, %v1811_v36 }
 0x248   : > { %v1778_v6 = vadd.f32 %v1734_v5, %v3847_v20  ;;  %v1943_v24 = vmax.f32 %v1911_v28, 0.0  ;;  %v1912_v17 = vadd.f32 %v3568_v53, %v1874_v42  ;;  %v1733_v58 = vsel %vm1412_vm3, %v1715_v22, %v1716_v2 }
 0x249   : > { %v1812_v40 = vrot.slane %v4131_v33, 2  ;;  %v2050_v12 = vmax.f32 %v2048_v21, %v2049_v4  ;;  %v1779_v1 = vadd.f32 %v1733_v58, %v3874_v19  ;;  %v1717_v47 = vrot.slane %v4150_v7, 1 }
 0x24a   : > { %v1875_v48 = vadd.f32 %v1831_v32, %v1778_v6  ;;  %v4223_v52 = vmax.f32 %v1686_v62, %v1687_v57  ;;  %v1977_v20 = vsel %vm1957_vm10, %v1943_v24, -1.0  ;;  %v1813_v27 = vrot.slane %v4159_v38, 2 }
 0x24b   : > { %v1830_v23 = vsel %vm1821_vm9, %v1811_v36, %v1812_v40  ;;  %v4230_v60 = vpop.f32.mrb[100].mxu0  ;;  %v2051_v44 = vrot.slane %v2050_v12, 1  ;;  %v2053_v33 = vmax.f32 %v1942_v56, %v1977_v20  ;;  %v1732_v7 = vsel %vm1412_vm3, %v1716_v2, %v1717_v47 }
 0x24c   : > { %v1913_v14 = vadd.f32 %v3568_v53, %v1875_v48  ;;  %v1876_v22 = vadd.f32 %v1830_v23, %v1779_v1  ;;  %v4233_v19 = vpop.f32.mrb[101].mxu0  ;;  %v1829_v62 = vsel %vm1821_vm9, %v1812_v40, %v1813_v27  ;;  %v1718_v21 = vrot.slane %v4163_v54, 1 }
 0x24d   : > { %v1814_v57 = vrot.slane %v4171_v35, 2  ;;  %v4241_v38 = vpop.f32.mrb[102].mxu0  ;;  %v2054_v37 = vrot.slane %v2053_v33, 4  ;;  %v1944_v36 = vmax.f32 %v1912_v17, 0.0  ;;  %v4246_v4 = vmax.f32 %v2050_v12, %v2051_v44 }
 0x24e   : > { %v1945_v28 = vmax.f32 %v1913_v14, 0.0  ;;  %v1914_v42 = vadd.f32 %v3568_v53, %v1876_v22  ;;  %v4244_v5 = vpop.f32.mrb[103].mxu0  ;;  %v1780_v2 = vadd.f32 %v1732_v7, %v3890_v51  ;;  %v1731_v56 = vsel %vm1412_vm3, %v1717_v47, %v1718_v21 }
 0x24f   : > { %v1828_v6 = vsel %vm1821_vm9, %v1813_v27, %v1814_v57  ;;  %v2055_v32 = vmax.f32 %v2053_v33, %v2054_v37  ;;  %v1781_v17 = vadd.f32 %v1731_v56, %v3916_v46  ;;  %v4563_v58 = vrot.slane %v3727_v55, 1 }
 0x250   : > { %v1979_v24 = vsel %vm1957_vm10, %v1945_v28, -1.0  ;;  %v1877_v12 = vadd.f32 %v1829_v62, %v1780_v2  ;;  %v1621_v48 = vrot.slane %v3772_v26, 1  ;;  %v4564_v1 = vrot.slane %v3777_v45, 2 }
 0x251   : > { %v1615_v51 = vmax.f32 %v3727_v55, %v4563_v58  ;;  %v2060_v40 = vmax.f32 %v1944_v36, %v1979_v24  ;;  %v2056_v20 = vrot.slane %v2055_v32, 2  ;;  %v1946_v23 = vmax.f32 %v1914_v42, 0.0 }
 0x252   : > { %v1627_v47 = vmax.f32 %v3777_v45, %v4564_v1  ;;  %v1878_v27 = vadd.f32 %v1828_v6, %v1781_v17  ;;  %v4565_v44 = vrot.slane %v3808_v59, 4  ;;  %v1915_v14 = vadd.f32 %v3568_v53, %v1877_v12 }
 0x253   : > { %v2061_v46 = vrot.slane %v2060_v40, 4  ;;  %v4566_v55 = vrot.slane %v4102_v15, 1  ;;  %v4274_v62 = vpop.f32.mrb[104].mxu0  ;;  %v2057_v37 = vmax.f32 %v2055_v32, %v2056_v20  ;;  %v1677_v28 = vrot.slane %v4165_v34, 1 }
 0x254   : > { %v1632_v33 = vmax.f32 %v3808_v59, %v4565_v44  ;;  %v1628_v22 = vrot.slane %v1627_v47, 1  ;;  %v4277_v45 = vadd.f32 %v3568_v53, %v1878_v27  ;;  %v4280_v42 = vpop.f32.mrb[105].mxu0  ;;  %v1947_v2 = vmax.f32 %v1915_v14, 0.0  ;;  %v4568_v44 = vld [vmem:[#allocation37_spill] sm:$0xff] }
 0x255   : > { %v1671_v7 = vmax.f32 %v4102_v15, %v4566_v55  ;;  %v2062_v59 = vmax.f32 %v2060_v40, %v2061_v46  ;;  %v1622_v56 = vmax.f32 %v3772_v26, %v1621_v48  ;;  %v1683_v6 = vmax.f32 %v4179_v3, %v1682_v61  ;;  %v4286_v15 = vpop.f32.mrb[106].mxu0  ;;  %v4567_v61 = vld [vmem:[#allocation32_spill] sm:$0xff] }
 0x256   : > { %v1633_v36 = vrot.slane %v1632_v33, 2  ;;  %v2058_v24 = vrot.slane %v2057_v37, 1  ;;  %v1948_v32 = vmax.f32 %v4277_v45, 0.0  ;;  %v1629_v17 = vmax.f32 %v1627_v47, %v1628_v22  ;;  %v4289_v12 = vpop.f32.mrb[107].mxu0 }
 0x257   : > { %v2063_v1 = vrot.slane %v2062_v59, 2  ;;  %v1981_v40 = vsel %vm1957_vm10, %v1947_v2, -1.0  ;;  %v1684_v20 = vrot.slane %v1683_v6, 1  ;;  %v1689_v26 = vrot.slane %v4223_v52, 2 }
 0x258   : > { %v1634_v58 = vmax.f32 %v1632_v33, %v1633_v36  ;;  %v2067_v48 = vmax.f32 %v1946_v23, %v1981_v40  ;;  %v1678_v3 = vmax.f32 %v4165_v34, %v1677_v28  ;;  %v2158_v46 = vsel %vm2120_vm1, %v4568_v44, %v4567_v61 }
 0x259   : > { %v4298_v14 = vmax.f32 %v2057_v37, %v2058_v24  ;;  %v2064_v47 = vmax.f32 %v2062_v59, %v2063_v1  ;;  %v1690_v33 = vmax.f32 %v4223_v52, %v1689_v26  ;;  %v2159_v22 = vsel %vm2122_vm2, %v3725_v41, %v2158_v46  ;;  %v4569_v24 = vld [vmem:[#allocation38_spill] sm:$0xff] }
 0x25a   : > { %v1635_v27 = vrot.slane %v1634_v58, 1  ;;  %v2068_v55 = vrot.slane %v2067_v48, 4  ;;  %v2160_v2 = vsel %vm2124_vm4, %v1615_v51, %v2159_v22  ;;  %v2164_v34 = vsel %vm2118_vm0, %v3976_v31, %v3910_v8 }
 0x25b   : > { %v1685_v23 = vmax.f32 %v1683_v6, %v1684_v20  ;;  %v1691_v28 = vrot.slane %v1690_v33, 1  ;;  %v2161_v40 = vsel %vm2126_vm6, %v1622_v56, %v2160_v2  ;;  %v2165_v37 = vsel %vm2120_vm1, %v4024_v13, %v2164_v34  ;;  %v4571_v13 = vld [vmem:[#allocation33_spill] sm:$0xff] }
 0x25c   : > { %v1636_v36 = vmax.f32 %v1634_v58, %v1635_v27  ;;  %v2069_v59 = vmax.f32 %v2067_v48, %v2068_v55  ;;  %v2162_v52 = vsel %vm2128_vm7, %v1629_v17, %v2161_v40  ;;  %v2166_v41 = vsel %vm2122_vm2, %v4076_v0, %v2165_v37  ;;  %v4570_v58 = vld [vmem:[#allocation30_spill] sm:$0xff] }
 0x25d   : > { %v2136_v51 = vsel %vm2126_vm6, %v4570_v58, %v4569_v24  ;;  %v2065_v1 = vrot.slane %v2064_v47, 1  ;;  %v1692_v26 = vmax.f32 %v1690_v33, %v1691_v28  ;;  %v2167_v31 = vsel %vm2124_vm4, %v1671_v7, %v2166_v41  ;;  %v4572_v48 = vld [vmem:[#allocation34_spill] sm:$0xff]  ;;  %v4573_v33 = vld [vmem:[#allocation31_spill] sm:$0xff]  ;;  %v2927_v28 = vld [vmem:[#allocation9 + $0x80] sm:$0xff]  }
 0x25e   : > { %v2163_v8 = vsel %vm2130_vm8, %v1636_v36, %v2162_v52  ;;  %v2070_v56 = vrot.slane %v2069_v59, 2  ;;  %v2168_v6 = vsel %vm2126_vm6, %v1678_v3, %v2167_v31  ;;  %v2137_v20 = vsel %vm2128_vm7, %v4571_v13, %v2136_v51  ;;  %v4574_v37 = vld [vmem:[#allocation42_spill] sm:$0xff]  ;;  %v4575_v58 = vld [vmem:[#allocation44_spill] sm:$0xff] }
 0x25f   : > { %v1719_v17 = vrot.slane %v4193_v11, 1  ;;  %v2169_v0 = vsel %vm2128_vm7, %v1685_v23, %v2168_v6  ;;  %v2138_v27 = vsel %vm2130_vm8, %v4572_v48, %v2137_v20  ;;  %v1815_v61 = vrot.slane %v4198_v16, 2  ;;  %v2928_v13 = vld [vmem:[#allocation9 + $0x88] sm:$0xff]  }
 0x260   : > { %v1720_v44 = vrot.slane %v4203_v49, 1  ;;  %v2071_v46 = vmax.f32 %v2069_v59, %v2070_v56  ;;  %v2170_v7 = vsel %vm2130_vm8, %v1692_v26, %v2169_v0  ;;  %v2205_v22 = vpack.c.bf16 %v2138_v27, %v4573_v33  ;;  %v4576_v26 = vld [vmem:[#allocation21_spill] sm:$0xff] }
 0x261   : > { %v1730_v3 = vsel %vm1412_vm3, %v1718_v21, %v1719_v17  ;;  %v2206_v11 = vpack.c.bf16 %v2170_v7, %v2163_v8  ;;  %v1827_v16 = vsel %vm1821_vm9, %v1814_v57, %v1815_v61  ;;  %v4340_v36 = vmax.f32 %v2064_v47, %v2065_v1 }
 0x262   : > { %v1782_v55 = vadd.f32 %v1730_v3, %v3931_v10  ;;  %v1729_v49 = vsel %vm1412_vm3, %v1719_v17, %v1720_v44  ;;  %v1816_v54 = vrot.slane %v4208_v30, 2  ;;  %v1721_v34 = vrot.slane %v4230_v60, 1  ;;  %v4579_v3 = vld [vmem:[#allocation22_spill] sm:$0xff] }
 0x263   : > { %v1783_v2 = vadd.f32 %v1729_v49, %v3957_v43  ;;  %2439 = vmatprep.mubr.bf16.mxu1 %v2206_v11  ;;  %v1817_v10 = vrot.slane %v4233_v19, 2  ;;  %v1722_v35 = vrot.slane %v4241_v38, 1  ;;  %v1818_v23 = vrot.slane %v4244_v5, 2 }
 0x264   : > { %v1879_v21 = vadd.f32 %v1827_v16, %v1782_v55  ;;  %v2072_v57 = vrot.slane %v2071_v46, 1  ;;  %2440 = vmatmul.mubr.bf16.vlgmr.msra.gmra.mrb[84].mxu1 %v2205_v22  ;;  %v1826_v47 = vsel %vm1821_vm9, %v1815_v61, %v1816_v54  ;;  %v1728_v43 = vsel %vm1412_vm3, %v1720_v44, %v1721_v34  ;;  %v4580_v16 = vld [vmem:[#allocation36_spill] sm:$0xff] }
 0x265   : > { %v1723_v30 = vrot.slane %v4274_v62, 1  ;;  %v1880_v40 = vadd.f32 %v1826_v47, %v1783_v2  ;;  %v1784_v19 = vadd.f32 %v1728_v43, %v4574_v37  ;;  %v1825_v38 = vsel %vm1821_vm9, %v1816_v54, %v1817_v10  ;;  %v2929_v54 = vld [vmem:[#allocation9 + $0x90] sm:$0xff]  }
 0x266   : > { %v1917_v60 = vadd.f32 %v3568_v53, %v1879_v21  ;;  %v1727_v5 = vsel %vm1412_vm3, %v1721_v34, %v1722_v35  ;;  %v1824_v59 = vsel %vm1821_vm9, %v1817_v10, %v1818_v23  ;;  %v3126_v1 = vmov 0.0  }
 0x267   : > { %v1726_v52 = vsel %vm1412_vm3, %v1722_v35, %v1723_v30  ;;  %v1918_v62 = vadd.f32 %v3568_v53, %v1880_v40  ;;  %v1881_v24 = vadd.f32 %v1825_v38, %v1784_v19  ;;  %v1785_v51 = vadd.f32 %v1727_v5, %v4575_v58  ;;  %2717 = vmatprep.subr.bf16.mxu1 %v3126_v1  ;;  %v2930_v40 = vld [vmem:[#allocation9 + $0x98] sm:$0xff]  }
 0x268   : > { %v1949_v41 = vmax.f32 %v1917_v60, 0.0  ;;  %v1786_v8 = vadd.f32 %v1726_v52, %v4576_v26  ;;  %v1819_v31 = vrot.slane %v4280_v42, 2  ;;  %2718 = vmatpush3.bf16.msra.mxu1 %v2927_v28  ;;  %v1724_v56 = vrot.slane %v4286_v15, 1  ;;  %2733 = vmatprep.mubr.msk.bf16.mxu1 %vm3127_vm11, %v3126_v1  ;;  %v4583_v52 = vld [vmem:[#allocation39_spill] sm:$0xff]  ;;  %v4585_v26 = vld [vmem:[#allocation41_spill] sm:$0xff] }
 0x269   : > { %v1820_v6 = vrot.slane %v4289_v12, 2  ;;  %v1950_v17 = vmax.f32 %v1918_v62, 0.0  ;;  %v1919_v0 = vadd.f32 %v3568_v53, %v1881_v24  ;;  %v1882_v48 = vadd.f32 %v1824_v59, %v1785_v51  ;;  %2719 = vmatprep.subr.bf16.mxu1 %v3126_v1  ;;  %v4577_v12 = vld [vmem:[#allocation35_spill] sm:$0xff] }
 0x26a   : > { %v1983_v20 = vsel %vm1957_vm10, %v1949_v41, -1.0  ;;  %v1823_v42 = vsel %vm1821_vm9, %v1818_v23, %v1819_v31  ;;  %v1725_v15 = vsel %vm1412_vm3, %v1723_v30, %v1724_v56  ;;  %v4578_v61 = vrot.slane %v4577_v12, 1  ;;  %v4584_v41 = vld [vmem:[#allocation40_spill] sm:$0xff] }
 0x26b   : > { %v2074_v27 = vmax.f32 %v1948_v32, %v1983_v20  ;;  %v1951_v7 = vmax.f32 %v1919_v0, 0.0  ;;  %v1920_v33 = vadd.f32 %v3568_v53, %v1882_v48  ;;  %v1883_v22 = vadd.f32 %v1823_v42, %v1786_v8  ;;  %v2931_v20 = vld [vmem:[#allocation9 + $0xa0] sm:$0xff]   ;;  %v4586_v0 = vld [vmem:[#allocation43_spill] sm:$0xff] }
 0x26c   : > { %v1756_v44 = vsel %vm1412_vm3, %v1724_v56, %v4578_v61  ;;  %v1787_v11 = vadd.f32 %v1725_v15, %v4579_v3  ;;  %v1822_v32 = vsel %vm1821_vm9, %v1819_v31, %v1820_v6  ;;  %v4581_v49 = vrot.slane %v4580_v16, 2  ;;  %2720 = vmatpush3.bf16.msra.mxu1 %v2928_v13  ;;  %v4587_v15 = vld [vmem:[#allocation45_spill] sm:$0xff] }
 0x26d   : > { %v2075_v55 = vrot.slane %v2074_v27, 4  ;;  %v1788_v45 = vadd.f32 %v1756_v44, %v4057_v9  ;;  %v2073_v34 = vmax.f32 %v2071_v46, %v2072_v57  ;;  %v1985_v21 = vsel %vm1957_vm10, %v1951_v7, -1.0  ;;  %2721 = vmatprep.subr.bf16.mxu1 %v3126_v1 }
 0x26e   : > { %v1853_v2 = vsel %vm1821_vm9, %v1820_v6, %v4581_v49  ;;  %v1921_v10 = vadd.f32 %v3568_v53, %v1883_v22  ;;  %v1884_v35 = vadd.f32 %v1822_v32, %v1787_v11  ;;  %v2081_v23 = vmax.f32 %v1950_v17, %v1985_v21  ;;  %v2932_v22 = vld [vmem:[#allocation9 + $0xa8] sm:$0xff]   ;;  %v2933_v49 = vld [vmem:[#allocation9 + $0xb0] sm:$0xff]  }
 0x26f   : > { %v2076_v9 = vmax.f32 %v2074_v27, %v2075_v55  ;;  %v1885_v47 = vadd.f32 %v1853_v2, %v1788_v45  ;;  %v1952_v43 = vmax.f32 %v1920_v33, 0.0  ;;  %v2037_v39 = vrot.slane %v4152_v29, 1 }
 0x270   : > { %v1953_v30 = vmax.f32 %v1921_v10, 0.0  ;;  %v1922_v28 = vadd.f32 %v3568_v53, %v1884_v35  ;;  %v2082_v57 = vrot.slane %v2081_v23, 4  ;;  %2722 = vmatpush3.bf16.msra.mxu1 %v2929_v54  ;;  %v2043_v37 = vmax.f32 %v4154_v25, %v2042_v18  ;;  %v2934_v35 = vld [vmem:[#allocation9 + $0xb8] sm:$0xff]  }
 0x271   : > { %v2077_v46 = vrot.slane %v2076_v9, 2  ;;  %v1923_v60 = vadd.f32 %v3568_v53, %v1885_v47  ;;  %2723 = vmatprep.subr.bf16.mxu1 %v3126_v1  ;;  %v4582_v5 = vrot.slane %v4081_v63, 1  ;;  %v2189_v53 = vsel %vm2118_vm0, %v4584_v41, %v4583_v52 }
 0x272   : > { %v1987_v19 = vsel %vm1957_vm10, %v1953_v30, -1.0  ;;  %v1954_v38 = vmax.f32 %v1922_v28, 0.0  ;;  %v2083_v24 = vmax.f32 %v2081_v23, %v2082_v57  ;;  %v2038_v25 = vmax.f32 %v4152_v29, %v2037_v39 }
 0x273   : > { %v2031_v59 = vmax.f32 %v4081_v63, %v4582_v5  ;;  %v2078_v62 = vmax.f32 %v2076_v9, %v2077_v46  ;;  %v2088_v58 = vmax.f32 %v1952_v43, %v1987_v19  ;;  %v1955_v51 = vmax.f32 %v1923_v60, 0.0 }
 0x274   : > { %v2044_v18 = vrot.slane %v2043_v37, 1  ;;  %v2190_v8 = vsel %vm2120_vm1, %v4585_v26, %v2189_v53  ;;  %v2196_v31 = vsel %vm2118_vm0, %v4298_v14, %v4246_v4  ;;  %v2084_v63 = vrot.slane %v2083_v24, 2  ;;  %2724 = vmatpush3.bf16.msra.mxu1 %v2930_v40 }
 0x275   : > { %v2079_v56 = vrot.slane %v2078_v62, 1  ;;  %v2089_v6 = vrot.slane %v2088_v58, 4  ;;  %v1989_v13 = vsel %vm1957_vm10, %v1955_v51, -1.0  ;;  %2725 = vmatprep.subr.bf16.mxu1 %v3126_v1  ;;  %v2191_v48 = vsel %vm2122_vm2, %v4586_v0, %v2190_v8 }
 0x276   : > { %v2095_v17 = vmax.f32 %v1954_v38, %v1989_v13  ;;  %v2045_v29 = vmax.f32 %v2043_v37, %v2044_v18  ;;  %v2197_v27 = vsel %vm2120_vm1, %v4340_v36, %v2196_v31  ;;  %v2085_v4 = vmax.f32 %v2083_v24, %v2084_v63 }
 0x277   : > { %v2080_v42 = vmax.f32 %v2078_v62, %v2079_v56  ;;  %v2090_v14 = vmax.f32 %v2088_v58, %v2089_v6  ;;  %v2192_v12 = vsel %vm2124_vm4, %v4587_v15, %v2191_v48  ;;  %v2198_v44 = vsel %vm2122_vm2, %v2073_v34, %v2197_v27 }
 0x278   : > { %v2096_v50 = vrot.slane %v2095_v17, 4  ;;  %v2193_v61 = vsel %vm2126_vm6, %v2031_v59, %v2192_v12  ;;  %v2086_v7 = vrot.slane %v2085_v4, 1  ;;  %2726 = vmatpush3.bf16.msra.mxu1 %v2931_v20 }
 0x279   : > { %v2091_v33 = vrot.slane %v2090_v14, 2  ;;  %v2194_v3 = vsel %vm2128_vm7, %v2038_v25, %v2193_v61  ;;  %v2199_v11 = vsel %vm2124_vm4, %v2080_v42, %v2198_v44  ;;  %2727 = vmatprep.subr.bf16.mxu1 %v3126_v1 }
 0x27a   : > { %v2097_v36 = vmax.f32 %v2095_v17, %v2096_v50  ;;  %v2195_v55 = vsel %vm2130_vm8, %v2045_v29, %v2194_v3  ;;  %v2087_v32 = vmax.f32 %v2085_v4, %v2086_v7 }
 0x27b   : > { %v2092_v45 = vmax.f32 %v2090_v14, %v2091_v33 }
 0x27c   : > { %v2098_v16 = vrot.slane %v2097_v36, 2  ;;  %2728 = vmatpush3.bf16.msra.mxu1 %v2932_v22  ;;  %v2200_v54 = vsel %vm2126_vm6, %v2087_v32, %v2199_v11 }
 0x27d   : > { %v2093_v2 = vrot.slane %v2092_v45, 1  ;;  %2729 = vmatprep.subr.bf16.mxu1 %v3126_v1 }
 0x27e   : > { %v2099_v34 = vmax.f32 %v2097_v36, %v2098_v16 }
 0x27f   : > { %v2094_v21 = vmax.f32 %v2092_v45, %v2093_v2 }
 0x280   : > { %v2100_v10 = vrot.slane %v2099_v34, 1  ;;  %2730 = vmatpush3.bf16.msra.mxu1 %v2933_v49 }
 0x281   : > { %v2201_v9 = vsel %vm2128_vm7, %v2094_v21, %v2200_v54  ;;  %2731 = vmatprep.subr.bf16.mxu1 %v3126_v1  ;;  %v2654_v1 = vld [vmem:[%s4502_s5] ss:$0 sm:$0xff] }
 0x282   : > { %v2101_v23 = vmax.f32 %v2099_v34, %v2100_v10 }
 0x284   : > { %v2202_v47 = vsel %vm2130_vm8, %v2101_v23, %v2201_v9  ;;  %2732 = vmatpush3.bf16.msra.mxu1 %v2934_v35 }
 0x285   : > { %v2207_v43 = vpack.c.bf16 %v2202_v47, %v2195_v55 }
 0x287   : > { %2734 = vmatmul.mubr.bf16.vlgmr.msra.gmra.mrb[88].mxu1 %v2207_v43 }
 0x337   : > { %v2702_v30 = vpop.f32.mrb[84].mxu1 }
 0x338   : > { %v2703_v28 = vpop.f32.mrb[85].mxu1 }
 0x339   : > { %v2704_v39 = vadd.f32 %v2703_v28, %v2702_v30  ;;  %v2705_v46 = vpop.f32.mrb[86].mxu1 }
 0x33a   : > { %v2706_v57 = vpop.f32.mrb[87].mxu1 }
 0x33b   : > { %v2707_v60 = vadd.f32 %v2706_v57, %v2705_v46  ;;  %v2442_v40 = vadd.f32 %v2704_v39, %v2654_v1 }
 0x33d   : > { %v2445_v5 = vadd.f32 %v2707_v60, %v2654_v1 }
 0x35a   : > { %v2482_v37 = vpop.f32.mrb[88].mxu1 }
 0x35b   : > { %v2483_v19 = vadd.f32 %v2482_v37, %v2442_v40  ;;  %v2735_v38 = vpop.f32.mrb[89].mxu1 }
 0x35c   : > { %v2485_v59 = vpop.f32.mrb[90].mxu1 }
 0x35d   : > { %2489 = vst [vmem:[%s3302_s22] sm:$0xff] %v2483_v19  ;;  %v2486_v52 = vadd.f32 %v2485_v59, %v2445_v5  ;;  %v2736_v41 = vpop.f32.mrb[91].mxu1 }
 0x35f   : > { %2490 = vst [vmem:[%s3302_s22 + $0x8] sm:$0xff] %v2486_v52 }
 0x360   : > { %3038 = shalt.err (!%p3035_p11)
}
 0x361   : > { %s3039_s22 = scalar_lea.hbm %s4448_s14, 256  ;;  %s3043_s2 = scalar_lea.hbm %s4503_s6, 512 }
 0x362   : > { %p3040_p0 = scmp.ne.s32.totalorder %s4448_s14, %s3039_s22  ;;  %p3044_p8 = scmp.lt.u32.totalorder %s4448_s14, %s4503_s6 }
 0x363   : > { %p3045_p9 = scmp.lt.u32.totalorder %s3043_s2, %s3039_s22  ;;  %p3047_p1 = scmp.lt.u32.totalorder %s3039_s22, %s4448_s14 }
 0x364   : > { %p3041_p2 = pnand %p3040_p0, %p4589_p13 }
 0x365   : > { %p3046_p12 = por %p3045_p9, %p3044_p8 }
 0x366   : > { %p3042_p3 = pneg %p3041_p2 }
 0x367   : > { %p3048_p4 = por %p3047_p1, %p3046_p12 }
 0x369   : > { %p3049_p5 = pnand %p3048_p4, %p3042_p3 }
 0x36b   : > { %3052 = shalt.err (!%p3049_p5)
}
 0x36c   : > { %s3129_s28 = smov 128   ;;  %s3130_s30 = smov 8  }
 0x36d   : > { %2761 = dma.vmem_to_hbm [thread:$0]  (%p4589_p13), %s4451_s20, 256, %s4448_s14, %s4456_s18, %s3129_s28, %s3129_s28, %s3130_s30  }
 0x36e PF: > { %p2778_p6 = scmp.ge.s32.totalorder %s3107_s10, 2  ;;  %s2520_s11 = sand.u32 1, %s3095_s7  }
 0x36f   : > { %p4590_p7 = scmp.ne.s32.totalorder %s4515_s17, 0  ;;  %s2521_s13 = scalar_lea.sflag [#allocation8], %s2520_s11 }
 0x371   : > { %p2771_p10 = pnand %p2778_p6, %p4590_p7 }
 0x373   : > { %3090 = dma.done.wait (!%p2771_p10), %s2521_s13, 256  }
 0x374   : > { %3092 = vsyncadd (!%p2771_p10), %s2521_s13, 4294967040  ;;  %p22_p11 = scmp.ge.s32.totalorder %s3203_s12, 4   ;;  %s4591_s7 = smov %s3099_s8 }
 0x375   : > { %s4592_s8 = smov %s3103_s9  ;;  %s4593_s9 = smov %s3214_s15 }
 0x376   : > { %s4594_s10 = smov %s3203_s12  ;;  %24 = sbr.rel (!%p22_p11) target bundleno = 17 (0x11), region = 119 }
 0x37d   :  { %2526 = vsyncpa [#allocation7], 1 }
 0x37e   :  { %2528 = vsyncpa [#allocation7 + $0x1], 1 }
 0x37f   :  { %2529 = vsyncpa [#allocation10], 1 }
 0x380   :  { %2530 = vsyncpa [#allocation8], 1 }
 0x381   :  { %2532 = vsyncpa [#allocation8 + $0x1], 1 }
 0x382   :  { %2533 = vsyncmov [#allocation3] }
 0x385   :  { %s2534_s10 = vpop.sfrf %2533 }
 0x386   :  { %p2684_p13 = scmp.ne.s32.totalorder %s2534_s10, 0 }
 0x388   :  { %2538 = shalt.err (%p2684_p13)  }

</bundles_post_ra>
